<compile_context>
chip_gen: v7x
topology: tpu7x:2x2x1
jax: 0.10.0
libtpu: 0.0.40
codegen_flags: <defaults>
</compile_context>

<pallas_src>
import jax
import jax.numpy as jnp
from jax.experimental import pallas as pl
from jax.experimental.pallas import tpu as pltpu

IN_DIM = 768 * 2      # 1536
HID_DIM = 384
OUT_DIM = 768


def _mlp_kernel(x_ref, w1_ref, b1_ref, w2_ref, b2_ref, o_ref):
    # First linear (bf16 x bf16 -> f32 accumulation on the MXU) + bias + ReLU in f32.
    h = jnp.dot(x_ref[...], w1_ref[...], preferred_element_type=jnp.float32)
    h = jnp.maximum(h + b1_ref[...], 0.0)          # (tb, 384) + (1, 384) broadcast
    # Second linear: single cast back to bf16 for the MXU, f32 accumulation.
    y = jnp.dot(h.astype(w2_ref.dtype), w2_ref[...],
                preferred_element_type=jnp.float32)
    o_ref[...] = (y + b2_ref[...]).astype(o_ref.dtype)


def _pick_tile_and_pad(B: int):
    """Return (batch_tile, padded_batch).

    B <= 128: single tile, no padding (weight-DMA / per-call-overhead bound;
    extra grid steps would only duplicate the resident-weight cost).
    Larger B: prefer the largest evenly-dividing tile in {1024, 512, 256, 128};
    otherwise pad the batch up to a multiple of 256 so x/out DMAs pipeline and
    the "parallel" batch axis can shard across v7x's two TensorCores.
    """
    if B <= 128:
        return B, B
    for tb in (1024, 512, 256, 128):
        if B % tb == 0:
            return tb, B
    tb = 256
    return tb, pl.cdiv(B, tb) * tb


def update_net_forward(x, w1_t, b1_row, w2_t, b2_row, *, out_dtype=jnp.bfloat16):
    """x: (B, 1536); w1_t: (1536, 384) bf16; b1_row: (1, 384) f32;
    w2_t: (384, 768) bf16; b2_row: (1, 768) f32.  Returns (B, 768) in out_dtype."""
    B = x.shape[0]
    tb, padded_B = _pick_tile_and_pad(B)

    x_bf16 = x.astype(jnp.bfloat16)
    if padded_B != B:
        # Zero-pad the batch; padded rows are computed and sliced off afterwards.
        x_bf16 = jnp.pad(x_bf16, ((0, padded_B - B), (0, 0)))

    grid = (padded_B // tb,)
    out_itemsize = jnp.dtype(out_dtype).itemsize

    cost = pl.CostEstimate(
        flops=2 * padded_B * (IN_DIM * HID_DIM + HID_DIM * OUT_DIM),
        transcendentals=0,
        bytes_accessed=(x_bf16.size * 2
                        + w1_t.size * 2 + w2_t.size * 2
                        + b1_row.size * 4 + b2_row.size * 4
                        + padded_B * OUT_DIM * out_itemsize),
    )

    out = pl.pallas_call(
        _mlp_kernel,
        out_shape=jax.ShapeDtypeStruct((padded_B, OUT_DIM), out_dtype),
        grid_spec=pltpu.PrefetchScalarGridSpec(
            num_scalar_prefetch=0,
            grid=grid,
            in_specs=[
                # x tile: pipelined (double-buffered) across the batch grid.
                pl.BlockSpec((tb, IN_DIM), lambda i: (i, 0)),
                # Resident weights/biases: constant block index -> single buffer.
                pl.BlockSpec((IN_DIM, HID_DIM), lambda i: (0, 0),
                             pipeline_mode=pl.Buffered(1)),
                pl.BlockSpec((1, HID_DIM), lambda i: (0, 0),
                             pipeline_mode=pl.Buffered(1)),
                pl.BlockSpec((HID_DIM, OUT_DIM), lambda i: (0, 0),
                             pipeline_mode=pl.Buffered(1)),
                pl.BlockSpec((1, OUT_DIM), lambda i: (0, 0),
                             pipeline_mode=pl.Buffered(1)),
            ],
            out_specs=pl.BlockSpec((tb, OUT_DIM), lambda i: (i, 0)),
        ),
        compiler_params=pltpu.CompilerParams(
            dimension_semantics=("parallel",),
            vmem_limit_bytes=32 * 1024 * 1024,  # fits v5e/v6e scoped and v7x 64 MiB
        ),
        cost_estimate=cost,
    )(x_bf16, w1_t, b1_row, w2_t, b2_row)

    if padded_B != B:
        out = out[:B]
    return out


def init_params(key):
    """Deterministic init mimicking nn.Linear default (uniform(-1/sqrt(in), 1/sqrt(in)))."""
    k1, k2, k3, k4 = jax.random.split(key, 4)
    bound1 = 1.0 / jnp.sqrt(IN_DIM)
    bound2 = 1.0 / jnp.sqrt(HID_DIM)
    # PyTorch stores W as (out, in); transposed + cast for the kernel in pack_params.
    w1 = jax.random.uniform(k1, (HID_DIM, IN_DIM), jnp.float32, -bound1, bound1)
    b1 = jax.random.uniform(k2, (HID_DIM,), jnp.float32, -bound1, bound1)
    w2 = jax.random.uniform(k3, (OUT_DIM, HID_DIM), jnp.float32, -bound2, bound2)
    b2 = jax.random.uniform(k4, (OUT_DIM,), jnp.float32, -bound2, bound2)
    return w1, b1, w2, b2


def pack_params(w1, b1, w2, b2):
    """Convert PyTorch-convention (out, in) f32 params to kernel layout."""
    w1_t = jnp.asarray(w1.T, dtype=jnp.bfloat16)       # (1536, 384) bf16
    w2_t = jnp.asarray(w2.T, dtype=jnp.bfloat16)       # (384, 768) bf16
    b1_row = b1.reshape(1, HID_DIM).astype(jnp.float32)
    b2_row = b2.reshape(1, OUT_DIM).astype(jnp.float32)
    return w1_t, b1_row, w2_t, b2_row


def reference_forward_f32(x, w1, b1, w2, b2):
    """Original module math in full f32."""
    h = jnp.maximum(x @ w1.T + b1, 0.0)
    return h @ w2.T + b2


def reference_forward_bf16(x, w1_t, b1_row, w2_t, b2_row):
    """Same bf16-weight / f32-accumulate recipe as the kernel (tight check, f32 result)."""
    xb = x.astype(jnp.bfloat16)
    h = jnp.dot(xb, w1_t, preferred_element_type=jnp.float32) + b1_row
    h = jnp.maximum(h, 0.0)
    y = jnp.dot(h.astype(jnp.bfloat16), w2_t, preferred_element_type=jnp.float32)
    return y + b2_row


def _check(out, x, w1, b1, w2, b2, w1_t, b1_row, w2_t, b2_row):
    out_f32 = out.astype(jnp.float32)
    # Tight check: same bf16-weight / f32-accumulation recipe as the kernel
    # (only remaining delta is the final bf16 output rounding / accumulation order).
    ref_bf16 = reference_forward_bf16(x, w1_t, b1_row, w2_t, b2_row)
    assert jnp.allclose(out_f32, ref_bf16, atol=3e-2, rtol=2e-2), "mismatch vs bf16 reference"
    # Loose check: original f32 module math (bf16 weights + bf16 output ~1e-2 error).
    ref_f32 = reference_forward_f32(x, w1, b1, w2, b2)
    assert jnp.allclose(out_f32, ref_f32, atol=8e-2, rtol=5e-2), "mismatch vs f32 reference"


if __name__ == "__main__":
    key = jax.random.PRNGKey(0)
    kx, kx2, kp = jax.random.split(key, 3)

    w1, b1, w2, b2 = init_params(kp)
    w1_t, b1_row, w2_t, b2_row = pack_params(w1, b1, w2, b2)

    # Small-batch path: single tile (weight-DMA-bound regime).
    B = 8
    x = jax.random.normal(kx, (B, IN_DIM), jnp.float32)
    out = jax.block_until_ready(update_net_forward(x, w1_t, b1_row, w2_t, b2_row))
    assert out.shape == (B, OUT_DIM) and out.dtype == jnp.bfloat16
    _check(out, x, w1, b1, w2, b2, w1_t, b1_row, w2_t, b2_row)

    # Ragged-batch path: B=300 -> padded to 512, tb=256, 2-step "parallel" grid.
    B2 = 300
    x2 = jax.random.normal(kx2, (B2, IN_DIM), jnp.float32)
    out2 = jax.block_until_ready(update_net_forward(x2, w1_t, b1_row, w2_t, b2_row))
    assert out2.shape == (B2, OUT_DIM) and out2.dtype == jnp.bfloat16
    _check(out2, x2, w1, b1, w2, b2, w1_t, b1_row, w2_t, b2_row)

    print("KERNEL_OK")
</pallas_src>

<mosaic_0001>
module attributes {stable_mosaic.version = 11 : i64} {
  func.func @_mlp_kernel(%arg0: i32, %arg1: memref<8x1536xbf16, #tpu.memory_space<vmem>>, %arg2: memref<1536x384xbf16, #tpu.memory_space<vmem>>, %arg3: memref<1x384xf32, #tpu.memory_space<vmem>>, %arg4: memref<384x768xbf16, #tpu.memory_space<vmem>>, %arg5: memref<1x768xf32, #tpu.memory_space<vmem>>, %arg6: memref<8x768xbf16, #tpu.memory_space<vmem>>) attributes {dimension_semantics = [#tpu.dimension_semantics<parallel>], iteration_bounds = array<i64: 1>, scalar_prefetch = 0 : i64, scratch_operands = 0 : i64, tpu.core_type = #tpu.core_type<tc>, window_params = [{transform_indices = @transform_0, window_bounds = array<i64: 8, 1536>}, {pipeline_mode = #tpu.pipeline_mode<synchronous>, transform_indices = @transform_1, window_bounds = array<i64: 1536, 384>}, {pipeline_mode = #tpu.pipeline_mode<synchronous>, transform_indices = @transform_2, window_bounds = array<i64: 1, 384>}, {pipeline_mode = #tpu.pipeline_mode<synchronous>, transform_indices = @transform_3, window_bounds = array<i64: 384, 768>}, {pipeline_mode = #tpu.pipeline_mode<synchronous>, transform_indices = @transform_4, window_bounds = array<i64: 1, 768>}, {transform_indices = @transform_5, window_bounds = array<i64: 8, 768>}]} {
    %c0 = arith.constant 0 : index
    %c0_0 = arith.constant 0 : index
    %0 = vector.load %arg1[%c0, %c0_0] : memref<8x1536xbf16, #tpu.memory_space<vmem>>, vector<8x1536xbf16>
    %c0_1 = arith.constant 0 : index
    %c0_2 = arith.constant 0 : index
    %1 = vector.load %arg2[%c0_1, %c0_2] : memref<1536x384xbf16, #tpu.memory_space<vmem>>, vector<1536x384xbf16>
    %cst = arith.constant dense<0.000000e+00> : vector<8x384xf32>
    %2 = tpu.matmul %0, %1, %cst {dimension_numbers = #tpu.dot_dimension_numbers<[1], [0], [0], [1], [0, 0, 1, 1], [], []>} : vector<8x1536xbf16>, vector<1536x384xbf16>, vector<8x384xf32> -> vector<8x384xf32>
    %c0_3 = arith.constant 0 : index
    %c0_4 = arith.constant 0 : index
    %3 = vector.load %arg3[%c0_3, %c0_4] : memref<1x384xf32, #tpu.memory_space<vmem>>, vector<1x384xf32>
    %4 = vector.broadcast %3 : vector<1x384xf32> to vector<8x384xf32>
    %5 = arith.addf %2, %4 : vector<8x384xf32>
    %cst_5 = arith.constant 0.000000e+00 : f32
    %6 = vector.broadcast %cst_5 : f32 to vector<8x384xf32>
    %7 = arith.maximumf %5, %6 : vector<8x384xf32>
    %8 = arith.truncf %7 : vector<8x384xf32> to vector<8x384xbf16>
    %c0_6 = arith.constant 0 : index
    %c0_7 = arith.constant 0 : index
    %9 = vector.load %arg4[%c0_6, %c0_7] : memref<384x768xbf16, #tpu.memory_space<vmem>>, vector<384x768xbf16>
    %cst_8 = arith.constant dense<0.000000e+00> : vector<8x768xf32>
    %10 = tpu.matmul %8, %9, %cst_8 {dimension_numbers = #tpu.dot_dimension_numbers<[1], [0], [0], [1], [0, 0, 1, 1], [], []>} : vector<8x384xbf16>, vector<384x768xbf16>, vector<8x768xf32> -> vector<8x768xf32>
    %c0_9 = arith.constant 0 : index
    %c0_10 = arith.constant 0 : index
    %11 = vector.load %arg5[%c0_9, %c0_10] : memref<1x768xf32, #tpu.memory_space<vmem>>, vector<1x768xf32>
    %12 = vector.broadcast %11 : vector<1x768xf32> to vector<8x768xf32>
    %13 = arith.addf %10, %12 : vector<8x768xf32>
    %14 = arith.truncf %13 : vector<8x768xf32> to vector<8x768xbf16>
    %c0_11 = arith.constant 0 : index
    %c0_12 = arith.constant 0 : index
    %15 = vector.load %arg6[%c0_11, %c0_12] : memref<8x768xbf16, #tpu.memory_space<vmem>>, vector<8x768xbf16>
    tpu.vector_store %arg6[%c0_11, %c0_12], %14 {strides = array<i32>} : memref<8x768xbf16, #tpu.memory_space<vmem>>, vector<8x768xbf16>,
    return
  }
  func.func @transform_0(%arg0: i32) -> (i32, i32) {
    %c0_i32 = arith.constant 0 : i32
    %c0_i32_0 = arith.constant 0 : i32
    return %arg0, %c0_i32 : i32, i32
  }
  func.func @transform_1(%arg0: i32) -> (i32, i32) {
    %c0_i32 = arith.constant 0 : i32
    %c0_i32_0 = arith.constant 0 : i32
    %c0_i32_1 = arith.constant 0 : i32
    return %c0_i32, %c0_i32_0 : i32, i32
  }
  func.func @transform_2(%arg0: i32) -> (i32, i32) {
    %c0_i32 = arith.constant 0 : i32
    %c0_i32_0 = arith.constant 0 : i32
    %c0_i32_1 = arith.constant 0 : i32
    return %c0_i32, %c0_i32_0 : i32, i32
  }
  func.func @transform_3(%arg0: i32) -> (i32, i32) {
    %c0_i32 = arith.constant 0 : i32
    %c0_i32_0 = arith.constant 0 : i32
    %c0_i32_1 = arith.constant 0 : i32
    return %c0_i32, %c0_i32_0 : i32, i32
  }
  func.func @transform_4(%arg0: i32) -> (i32, i32) {
    %c0_i32 = arith.constant 0 : i32
    %c0_i32_0 = arith.constant 0 : i32
    %c0_i32_1 = arith.constant 0 : i32
    return %c0_i32, %c0_i32_0 : i32, i32
  }
  func.func @transform_5(%arg0: i32) -> (i32, i32) {
    %c0_i32 = arith.constant 0 : i32
    %c0_i32_0 = arith.constant 0 : i32
    return %arg0, %c0_i32 : i32, i32
  }
}

</mosaic_0001>

<bundles_post_ra>
// kernel: tpu_custom_call.1
= control target key start
LH: loop header
LB: loop body
LE: loop exit
PB: predicated region body
PF: predicated region fallthrough
CT: control target
= control target key end

     0   :  { %10 = vsyncpa [#allocation3], 0  ;;  %s5361_s0 = inlined_call_operand.hbm [shape: bf16[8,1536], index: 0, kind: input, shape index: {}]   ;;  %s5362_s1 = inlined_call_operand.hbm [shape: bf16[1536,384], index: 1, kind: input, shape index: {}]   ;;  %s5363_s2 = inlined_call_operand.hbm [shape: f32[1,384], index: 2, kind: input, shape index: {}]   ;;  %s5364_s3 = inlined_call_operand.hbm [shape: bf16[384,768], index: 3, kind: input, shape index: {}]   ;;  %s5365_s4 = inlined_call_operand.hbm [shape: f32[1,768], index: 4, kind: input, shape index: {}]   ;;  %s5366_s5 = inlined_call_operand.hbm [shape: bf16[8,768], index: 5, kind: output, shape index: {}]  }
   0x1   :  { %11 = vsyncpa [#allocation6], 0 }
   0x2   :  { %12 = vsyncpa [#allocation9], 0 }
   0x3   :  { %13 = vsyncpa [#allocation4], 0  ;;  %s5130_s18 = smov [#allocation5]   ;;  %s4990_s22 = scalar_lea.hbm %s5362_s1, 36864 }
   0x4   :  { %s29_s19 = sshll.u32 %s5130_s18, 4  ;;  %p4991_p0 = scmp.ne.s32.totalorder %s5362_s1, %s4990_s22  ;;  %s30_s19 = int_to_ptr.vmem [resolvable:$true] %s29_s19 }
   0x5   :  { %p4994_p1 = scmp.lt.u32.totalorder %s4990_s22, %s5362_s1 }
   0x7   :  { %p4996_p2 = pnand %p4994_p1, %p4991_p0 }
   0x9   :  { %4999 = shalt.err (!%p4996_p2)
}
   0xa   :  { %s5000_s27 = scalar_lea.vmem %s30_s19, 36864  ;;  %p5005_p4 = scmp.lt.s32.totalorder %s30_s19, %s30_s19 }
   0xb   :  { %p5001_p3 = scmp.ne.s32.totalorder %s30_s19, %s5000_s27  ;;  %p5006_p5 = scmp.lt.s32.totalorder %s5000_s27, %s5000_s27 }
   0xd   :  { %p5007_p6 = por %p5006_p5, %p5005_p4 }
   0xf   :  { %p5008_p7 = pnand %p5007_p6, %p5001_p3 }
  0x11   :  { %5011 = shalt.err (!%p5008_p7)
}
  0x12   :  { %s5131_s28 = smov 192   ;;  %s5132_s29 = smov 12  }
  0x13   :  { %35 = dma.hbm_to_vmem [thread:$0]  %s5362_s1, 36864, %s30_s19, [#allocation6], %s5131_s28, %s5131_s28, %s5132_s29  }
  0x14   :  { %s5133_s7 = smov [#allocation8]   ;;  %s5012_s11 = scalar_lea.hbm %s5364_s3, 18432 }
  0x15   :  { %s51_s8 = sshll.u32 %s5133_s7, 4  ;;  %p5013_p8 = scmp.ne.s32.totalorder %s5364_s3, %s5012_s11  ;;  %s52_s8 = int_to_ptr.vmem [resolvable:$true] %s51_s8 }
  0x16   :  { %p5016_p9 = scmp.lt.u32.totalorder %s5012_s11, %s5364_s3 }
  0x18   :  { %p5018_p10 = pnand %p5016_p9, %p5013_p8 }
  0x1a   :  { %5021 = shalt.err (!%p5018_p10)
}
  0x1b   :  { %s5022_s16 = scalar_lea.vmem %s52_s8, 18432  ;;  %p5027_p12 = scmp.lt.s32.totalorder %s52_s8, %s52_s8 }
  0x1c   :  { %p5023_p11 = scmp.ne.s32.totalorder %s52_s8, %s5022_s16  ;;  %p5028_p13 = scmp.lt.s32.totalorder %s5022_s16, %s5022_s16 }
  0x1e   :  { %p5029_p0 = por %p5028_p13, %p5027_p12 }
  0x20   :  { %p5030_p1 = pnand %p5029_p0, %p5023_p11 }
  0x22   :  { %5033 = shalt.err (!%p5030_p1)
}
  0x23   :  { %s5134_s1 = smov 384   ;;  %s5135_s17 = smov 24  }
  0x24   :  { %57 = dma.hbm_to_vmem [thread:$0]  %s5364_s3, 18432, %s52_s8, [#allocation9], %s5134_s1, %s5134_s1, %s5135_s17  }
  0x25   :  { %s5136_s20 = smov [#allocation2]   ;;  %s5137_s22 = smov [#allocation7]  }
  0x26   :  { %s20_s21 = sshll.u32 %s5136_s20, 4  ;;  %s42_s23 = sshll.u32 %s5137_s22, 4  ;;  %s21_s21 = int_to_ptr.vmem [resolvable:$true] %s20_s21  ;;  %s43_s23 = int_to_ptr.vmem [resolvable:$true] %s42_s23 }
  0x27   :  { %s5034_s26 = scalar_lea.hbm %s5361_s0, 768 }
  0x28   :  { %p5035_p2 = scmp.ne.s32.totalorder %s5361_s0, %s5034_s26  ;;  %p5038_p3 = scmp.lt.u32.totalorder %s5034_s26, %s5361_s0 }
  0x2a   :  { %p5040_p4 = pnand %p5038_p3, %p5035_p2 }
  0x2c   :  { %5043 = shalt.err (!%p5040_p4)
}
  0x2d   :  { %s5044_s3 = scalar_lea.vmem %s21_s21, 768  ;;  %p5049_p6 = scmp.lt.s32.totalorder %s21_s21, %s21_s21 }
  0x2e   :  { %p5045_p5 = scmp.ne.s32.totalorder %s21_s21, %s5044_s3  ;;  %p5050_p7 = scmp.lt.s32.totalorder %s5044_s3, %s5044_s3 }
  0x30   :  { %p5051_p8 = por %p5050_p7, %p5049_p6 }
  0x32   :  { %p5052_p9 = pnand %p5051_p8, %p5045_p5 }
  0x34   :  { %5055 = shalt.err (!%p5052_p9)
}
  0x35   :  { %23 = dma.hbm_to_vmem [thread:$0]  %s5361_s0, 768, %s21_s21, [#allocation3]  }
  0x36   :  { %s5056_s10 = scalar_lea.hbm %s5363_s2, 48 }
  0x37   :  { %p5057_p10 = scmp.ne.s32.totalorder %s5363_s2, %s5056_s10  ;;  %p5060_p11 = scmp.lt.u32.totalorder %s5056_s10, %s5363_s2 }
  0x39   :  { %p5062_p12 = pnand %p5060_p11, %p5057_p10 }
  0x3b   :  { %5065 = shalt.err (!%p5062_p12)
}
  0x3c   :  { %s5066_s15 = scalar_lea.vmem %s43_s23, 48  ;;  %s5070_s16 = scalar_lea.vmem %s43_s23, 64 }
  0x3d   :  { %p5067_p13 = scmp.ne.s32.totalorder %s43_s23, %s5066_s15  ;;  %p5071_p0 = scmp.lt.s32.totalorder %s43_s23, %s43_s23 }
  0x3e   :  { %p5072_p1 = scmp.lt.s32.totalorder %s5070_s16, %s5066_s15 }
  0x40   :  { %p5073_p2 = por %p5072_p1, %p5071_p0 }
  0x42   :  { %p5074_p3 = pnand %p5073_p2, %p5067_p13 }
  0x44   :  { %5077 = shalt.err (!%p5074_p3)
}
  0x45   :  { %45 = dma.hbm_to_vmem [thread:$0]  %s5363_s2, 48, %s43_s23, [#allocation6]  }
  0x46   :  { %s5138_s17 = smov [#allocation10]   ;;  %s5078_s21 = scalar_lea.hbm %s5365_s4, 96 }
  0x47   :  { %s64_s18 = sshll.u32 %s5138_s17, 4  ;;  %p5079_p4 = scmp.ne.s32.totalorder %s5365_s4, %s5078_s21  ;;  %s65_s18 = int_to_ptr.vmem [resolvable:$true] %s64_s18 }
  0x48   :  { %p5082_p5 = scmp.lt.u32.totalorder %s5078_s21, %s5365_s4 }
  0x4a   :  { %p5084_p6 = pnand %p5082_p5, %p5079_p4 }
  0x4c   :  { %5087 = shalt.err (!%p5084_p6)
}
  0x4d   :  { %s5088_s27 = scalar_lea.vmem %s65_s18, 96  ;;  %p5093_p8 = scmp.lt.s32.totalorder %s65_s18, %s65_s18 }
  0x4e   :  { %p5089_p7 = scmp.ne.s32.totalorder %s65_s18, %s5088_s27  ;;  %p5094_p9 = scmp.lt.s32.totalorder %s5088_s27, %s5088_s27 }
  0x50   :  { %p5095_p10 = por %p5094_p9, %p5093_p8 }
  0x52   :  { %p5096_p11 = pnand %p5095_p10, %p5089_p7 }
  0x54   :  { %5099 = shalt.err (!%p5096_p11)
}
  0x55   :  { %67 = dma.hbm_to_vmem [thread:$0]  %s5365_s4, 96, %s65_s18, [#allocation9]  }
  0x56   :  { %5122 = dma.done.wait [#allocation3], 768  }
  0x57   :  { %5123 = vsyncadd [#allocation3], 4294966528 }
  0x58   :  { %5124 = dma.done.wait [#allocation6], 36912  }
  0x59   :  { %5125 = vsyncadd [#allocation6], 4294930384 }
  0x5a   :  { %5126 = dma.done.wait [#allocation9], 18528  }
  0x5b   :  { %5127 = vsyncadd [#allocation9], 4294948768  ;;  %v4378_v0 = vld [vmem:[#allocation5 + $0x4] ss:$12 sps:$4 sm:$0xff]   ;;  %v4382_v2 = vld [vmem:[#allocation5] ss:$12 sps:$4 sm:$0xff]  }
  0x5c   :  { %v4380_v1 = vld [vmem:[#allocation5 + $0x184] ss:$12 sps:$4 sm:$0xff]   ;;  %2069 = vmatprep.subr.bf16.mxu1 %v4378_v0  ;;  %v4383_v3 = vld [vmem:[#allocation5 + $0x180] ss:$12 sps:$4 sm:$0xff]   ;;  %v4384_v4 = vld [vmem:[#allocation5 + $0x1c] ss:$12 sps:$4 sm:$0xff]  }
  0x5d   :  { %2110 = vmatprep.subr.bf16.mxu0 %v4380_v1  ;;  %2070 = vmatpush1.bf16.msra.mxu1 %v4382_v2  ;;  %v4386_v5 = vld [vmem:[#allocation5 + $0x19c] ss:$12 sps:$4 sm:$0xff]   ;;  %v4388_v6 = vld [vmem:[#allocation5 + $0x18] ss:$12 sps:$4 sm:$0xff]   ;;  %v4390_v8 = vld [vmem:[#allocation5 + $0x34] ss:$12 sps:$4 sm:$0xff]  }
  0x5e   :  { %2111 = vmatpush1.bf16.msra.mxu0 %v4383_v3  ;;  %2071 = vmatprep.subr.bf16.mxu1 %v4384_v4  ;;  %v4389_v7 = vld [vmem:[#allocation5 + $0x198] ss:$12 sps:$4 sm:$0xff]   ;;  %v4392_v9 = vld [vmem:[#allocation5 + $0x1b4] ss:$12 sps:$4 sm:$0xff]   ;;  %v4394_v10 = vld [vmem:[#allocation5 + $0x30] ss:$12 sps:$4 sm:$0xff]  }
  0x5f   :  { %2112 = vmatprep.subr.bf16.mxu0 %v4386_v5  ;;  %v4395_v11 = vld [vmem:[#allocation5 + $0x1b0] ss:$12 sps:$4 sm:$0xff]   ;;  %v4396_v12 = vld [vmem:[#allocation5 + $0x4c] ss:$12 sps:$4 sm:$0xff]   ;;  %v4400_v14 = vld [vmem:[#allocation5 + $0x48] ss:$12 sps:$4 sm:$0xff]  }
  0x60   :  { %v4398_v13 = vld [vmem:[#allocation5 + $0x1cc] ss:$12 sps:$4 sm:$0xff]   ;;  %v4401_v15 = vld [vmem:[#allocation5 + $0x1c8] ss:$12 sps:$4 sm:$0xff]   ;;  %v4402_v16 = vld [vmem:[#allocation5 + $0x64] ss:$12 sps:$4 sm:$0xff]  }
  0x61   :  { %2072 = vmatpush1.bf16.msra.mxu1 %v4388_v6  ;;  %v4404_v17 = vld [vmem:[#allocation5 + $0x1e4] ss:$12 sps:$4 sm:$0xff]   ;;  %v4406_v18 = vld [vmem:[#allocation5 + $0x60] ss:$12 sps:$4 sm:$0xff]   ;;  %v4408_v20 = vld [vmem:[#allocation5 + $0x7c] ss:$12 sps:$4 sm:$0xff]  }
  0x62   :  { %2113 = vmatpush1.bf16.msra.mxu0 %v4389_v7  ;;  %2073 = vmatprep.subr.bf16.mxu1 %v4390_v8  ;;  %v4407_v19 = vld [vmem:[#allocation5 + $0x1e0] ss:$12 sps:$4 sm:$0xff]   ;;  %v4410_v21 = vld [vmem:[#allocation5 + $0x1fc] ss:$12 sps:$4 sm:$0xff]   ;;  %v4412_v22 = vld [vmem:[#allocation5 + $0x78] ss:$12 sps:$4 sm:$0xff]  }
  0x63   :  { %2114 = vmatprep.subr.bf16.mxu0 %v4392_v9  ;;  %v4413_v23 = vld [vmem:[#allocation5 + $0x1f8] ss:$12 sps:$4 sm:$0xff]   ;;  %v4414_v24 = vld [vmem:[#allocation5 + $0x94] ss:$12 sps:$4 sm:$0xff]   ;;  %v4418_v26 = vld [vmem:[#allocation5 + $0x90] ss:$12 sps:$4 sm:$0xff]  }
  0x64   :  { %v4416_v25 = vld [vmem:[#allocation5 + $0x214] ss:$12 sps:$4 sm:$0xff]   ;;  %v4419_v27 = vld [vmem:[#allocation5 + $0x210] ss:$12 sps:$4 sm:$0xff]   ;;  %v4420_v28 = vld [vmem:[#allocation5 + $0xac] ss:$12 sps:$4 sm:$0xff]  }
  0x65   :  { %2074 = vmatpush1.bf16.msra.mxu1 %v4394_v10  ;;  %v4422_v29 = vld [vmem:[#allocation5 + $0x22c] ss:$12 sps:$4 sm:$0xff]   ;;  %v4424_v30 = vld [vmem:[#allocation5 + $0xa8] ss:$12 sps:$4 sm:$0xff]   ;;  %v4426_v32 = vld [vmem:[#allocation5 + $0xc4] ss:$12 sps:$4 sm:$0xff]  }
  0x66   :  { %2115 = vmatpush1.bf16.msra.mxu0 %v4395_v11  ;;  %2075 = vmatprep.subr.bf16.mxu1 %v4396_v12  ;;  %v4425_v31 = vld [vmem:[#allocation5 + $0x228] ss:$12 sps:$4 sm:$0xff]   ;;  %v4428_v33 = vld [vmem:[#allocation5 + $0x244] ss:$12 sps:$4 sm:$0xff]   ;;  %v4430_v34 = vld [vmem:[#allocation5 + $0xc0] ss:$12 sps:$4 sm:$0xff]  }
  0x67   :  { %2116 = vmatprep.subr.bf16.mxu0 %v4398_v13  ;;  %v4431_v35 = vld [vmem:[#allocation5 + $0x240] ss:$12 sps:$4 sm:$0xff]   ;;  %v4432_v36 = vld [vmem:[#allocation5 + $0xdc] ss:$12 sps:$4 sm:$0xff]   ;;  %v4436_v38 = vld [vmem:[#allocation5 + $0xd8] ss:$12 sps:$4 sm:$0xff]  }
  0x68   :  { %v4434_v37 = vld [vmem:[#allocation5 + $0x25c] ss:$12 sps:$4 sm:$0xff]   ;;  %v4437_v39 = vld [vmem:[#allocation5 + $0x258] ss:$12 sps:$4 sm:$0xff]   ;;  %v4438_v40 = vld [vmem:[#allocation5 + $0xf4] ss:$12 sps:$4 sm:$0xff]  }
  0x69   :  { %2076 = vmatpush1.bf16.msra.mxu1 %v4400_v14  ;;  %v4440_v41 = vld [vmem:[#allocation5 + $0x274] ss:$12 sps:$4 sm:$0xff]   ;;  %v4442_v42 = vld [vmem:[#allocation5 + $0xf0] ss:$12 sps:$4 sm:$0xff]   ;;  %v4444_v44 = vld [vmem:[#allocation5 + $0x10c] ss:$12 sps:$4 sm:$0xff]  }
  0x6a   :  { %2117 = vmatpush1.bf16.msra.mxu0 %v4401_v15  ;;  %2077 = vmatprep.subr.bf16.mxu1 %v4402_v16  ;;  %v4443_v43 = vld [vmem:[#allocation5 + $0x270] ss:$12 sps:$4 sm:$0xff]   ;;  %v4446_v45 = vld [vmem:[#allocation5 + $0x28c] ss:$12 sps:$4 sm:$0xff]   ;;  %v4448_v46 = vld [vmem:[#allocation5 + $0x108] ss:$12 sps:$4 sm:$0xff]  }
  0x6b   :  { %2118 = vmatprep.subr.bf16.mxu0 %v4404_v17  ;;  %v84_v47 = vld [vmem:[#allocation2] sm:$0xff]  ;;  %v85_v49 = vld [vmem:[#allocation2 + $0x8] sm:$0xff]  ;;  %v4454_v54 = vld [vmem:[#allocation5 + $0x120] ss:$12 sps:$4 sm:$0xff]   ;;  %s5140_s4 = smov [#allocation11]  }
  0x6c   :  { %v5231_v48 = vcombine.high %v84_v47, %v84_v47  ;;  %v4449_v50 = vld [vmem:[#allocation5 + $0x288] ss:$12 sps:$4 sm:$0xff]   ;;  %v4450_v51 = vld [vmem:[#allocation5 + $0x124] ss:$12 sps:$4 sm:$0xff]   ;;  %v5233_v52 = vcombine.high %v85_v49, %v85_v49  ;;  %v4455_v55 = vld [vmem:[#allocation5 + $0x2a0] ss:$12 sps:$4 sm:$0xff]   ;;  %v5237_v6 = vcombine.low %v84_v47, %v84_v47  ;;  %v5239_v7 = vcombine.low %v85_v49, %v85_v49 }
  0x6d   :  { %2078 = vmatpush1.bf16.msra.mxu1 %v4406_v18  ;;  %v4452_v53 = vld [vmem:[#allocation5 + $0x2a4] ss:$12 sps:$4 sm:$0xff]   ;;  %v4456_v56 = vld [vmem:[#allocation5 + $0x13c] ss:$12 sps:$4 sm:$0xff]   ;;  %v4462_v60 = vld [vmem:[#allocation5 + $0x154] ss:$12 sps:$4 sm:$0xff]  }
  0x6e   :  { %2119 = vmatpush1.bf16.msra.mxu0 %v4407_v19  ;;  %2079 = vmatprep.subr.bf16.mxu1 %v4408_v20  ;;  %v4458_v57 = vld [vmem:[#allocation5 + $0x2bc] ss:$12 sps:$4 sm:$0xff]   ;;  %v4460_v58 = vld [vmem:[#allocation5 + $0x138] ss:$12 sps:$4 sm:$0xff]   ;;  %v4464_v61 = vld [vmem:[#allocation5 + $0x2d4] ss:$12 sps:$4 sm:$0xff]  }
  0x6f   :  { %2120 = vmatprep.subr.bf16.mxu0 %v4410_v21  ;;  %2101 = vmatprep.mubr.bf16.mxu1 %v5231_v48  ;;  %v4461_v59 = vld [vmem:[#allocation5 + $0x2b8] ss:$12 sps:$4 sm:$0xff]   ;;  %v4466_v62 = vld [vmem:[#allocation5 + $0x150] ss:$12 sps:$4 sm:$0xff]   ;;  %v4472_v2 = vld [vmem:[#allocation5 + $0x168] ss:$12 sps:$4 sm:$0xff]  }
  0x70   :  { %2142 = vmatprep.mubr.bf16.mxu0 %v5233_v52  ;;  %v4467_v63 = vld [vmem:[#allocation5 + $0x2d0] ss:$12 sps:$4 sm:$0xff]   ;;  %v4468_v0 = vld [vmem:[#allocation5 + $0x16c] ss:$12 sps:$4 sm:$0xff]   ;;  %v4473_v3 = vld [vmem:[#allocation5 + $0x2e8] ss:$12 sps:$4 sm:$0xff]  }
  0x71   :  { %2080 = vmatpush1.bf16.msra.mxu1 %v4412_v22  ;;  %v4470_v1 = vld [vmem:[#allocation5 + $0x2ec] ss:$12 sps:$4 sm:$0xff]   ;;  %v4480_v4 = vld [vmem:[#allocation5 + $0x304] ss:$12 sps:$4 sm:$0xff]   ;;  %v4481_v5 = vld [vmem:[#allocation5 + $0xc8] ss:$12 sps:$4 sm:$0xff]  }
  0x72   :  { %2121 = vmatpush1.bf16.msra.mxu0 %v4413_v23  ;;  %2081 = vmatprep.subr.bf16.mxu1 %v4414_v24  ;;  %v4478_v8 = vld [vmem:[#allocation5 + $0x300] ss:$12 sps:$4 sm:$0xff]   ;;  %v4482_v9 = vld [vmem:[#allocation5 + $0x8] ss:$12 sps:$4 sm:$0xff]   ;;  %v4483_v12 = vld [vmem:[#allocation5 + $0x318] ss:$12 sps:$4 sm:$0xff]  }
  0x73   :  { %2122 = vmatprep.subr.bf16.mxu0 %v4416_v25  ;;  %v4485_v10 = vld [vmem:[#allocation5 + $0x31c] ss:$12 sps:$4 sm:$0xff]   ;;  %v4486_v11 = vld [vmem:[#allocation5 + $0xe0] ss:$12 sps:$4 sm:$0xff]   ;;  %v4491_v15 = vld [vmem:[#allocation5 + $0xf8] ss:$12 sps:$4 sm:$0xff]  }
  0x74   :  { %v4487_v13 = vld [vmem:[#allocation5 + $0x20] ss:$12 sps:$4 sm:$0xff]   ;;  %v4488_v16 = vld [vmem:[#allocation5 + $0x330] ss:$12 sps:$4 sm:$0xff]   ;;  %v4492_v17 = vld [vmem:[#allocation5 + $0x38] ss:$12 sps:$4 sm:$0xff]  }
  0x75   :  { %2082 = vmatpush1.bf16.msra.mxu1 %v4418_v26  ;;  %v4490_v14 = vld [vmem:[#allocation5 + $0x334] ss:$12 sps:$4 sm:$0xff]   ;;  %v4495_v18 = vld [vmem:[#allocation5 + $0x34c] ss:$12 sps:$4 sm:$0xff]   ;;  %v4496_v19 = vld [vmem:[#allocation5 + $0x110] ss:$12 sps:$4 sm:$0xff]  }
  0x76   :  { %2123 = vmatpush1.bf16.msra.mxu0 %v4419_v27  ;;  %2083 = vmatprep.subr.bf16.mxu1 %v4420_v28  ;;  %v4493_v20 = vld [vmem:[#allocation5 + $0x348] ss:$12 sps:$4 sm:$0xff]   ;;  %v4497_v21 = vld [vmem:[#allocation5 + $0x50] ss:$12 sps:$4 sm:$0xff]   ;;  %v4498_v24 = vld [vmem:[#allocation5 + $0x360] ss:$12 sps:$4 sm:$0xff]  }
  0x77   :  { %2124 = vmatprep.subr.bf16.mxu0 %v4422_v29  ;;  %v4500_v22 = vld [vmem:[#allocation5 + $0x364] ss:$12 sps:$4 sm:$0xff]   ;;  %v4501_v23 = vld [vmem:[#allocation5 + $0x128] ss:$12 sps:$4 sm:$0xff]   ;;  %v4506_v27 = vld [vmem:[#allocation5 + $0x140] ss:$12 sps:$4 sm:$0xff]  }
  0x78   :  { %v4502_v25 = vld [vmem:[#allocation5 + $0x68] ss:$12 sps:$4 sm:$0xff]   ;;  %v4503_v28 = vld [vmem:[#allocation5 + $0x378] ss:$12 sps:$4 sm:$0xff]   ;;  %v4507_v29 = vld [vmem:[#allocation5 + $0x80] ss:$12 sps:$4 sm:$0xff]  }
  0x79   :  { %2084 = vmatpush1.bf16.msra.mxu1 %v4424_v30  ;;  %v4505_v26 = vld [vmem:[#allocation5 + $0x37c] ss:$12 sps:$4 sm:$0xff]   ;;  %v4510_v30 = vld [vmem:[#allocation5 + $0x394] ss:$12 sps:$4 sm:$0xff]   ;;  %v4531_v49 = vld [vmem:[#allocation5 + $0x278] ss:$12 sps:$4 sm:$0xff]  }
  0x7a   :  { %2125 = vmatpush1.bf16.msra.mxu0 %v4425_v31  ;;  %2085 = vmatprep.subr.bf16.mxu1 %v4426_v32  ;;  %v4511_v31 = vld [vmem:[#allocation5 + $0x158] ss:$12 sps:$4 sm:$0xff]   ;;  %v4508_v32 = vld [vmem:[#allocation5 + $0x390] ss:$12 sps:$4 sm:$0xff]   ;;  %v4527_v47 = vld [vmem:[#allocation5 + $0x1a0] ss:$12 sps:$4 sm:$0xff]  }
  0x7b   :  { %2126 = vmatprep.subr.bf16.mxu0 %v4428_v33  ;;  %v4512_v33 = vld [vmem:[#allocation5 + $0x98] ss:$12 sps:$4 sm:$0xff]   ;;  %s3736_s28 = sshll.u32 %s5140_s4, 4  ;;  %s3737_s28 = int_to_ptr.vmem [resolvable:$true] %s3736_s28 }
  0x7c   :  { %s5100_s29 = scalar_lea.vmem %s3737_s28, 384  ;;  %p5105_p13 = scmp.lt.s32.totalorder %s3737_s28, %s3737_s28 }
  0x7d   :  { %2086 = vmatpush1.bf16.msra.mxu1 %v4430_v34  ;;  %v4515_v34 = vld [vmem:[#allocation5 + $0x3ac] ss:$12 sps:$4 sm:$0xff]   ;;  %p5101_p12 = scmp.ne.s32.totalorder %s3737_s28, %s5100_s29  ;;  %p5106_p0 = scmp.lt.s32.totalorder %s5100_s29, %s5100_s29 }
  0x7e   :  { %2127 = vmatpush1.bf16.msra.mxu0 %v4431_v35  ;;  %2087 = vmatprep.subr.bf16.mxu1 %v4432_v36  ;;  %v4516_v35 = vld [vmem:[#allocation5 + $0x170] ss:$12 sps:$4 sm:$0xff]   ;;  %v4513_v36 = vld [vmem:[#allocation5 + $0x3a8] ss:$12 sps:$4 sm:$0xff]  }
  0x7f   :  { %2128 = vmatprep.subr.bf16.mxu0 %v4434_v37  ;;  %v4517_v37 = vld [vmem:[#allocation5 + $0xb0] ss:$12 sps:$4 sm:$0xff]   ;;  %p5107_p1 = por %p5106_p0, %p5105_p13 }
  0x81   :  { %2088 = vmatpush1.bf16.msra.mxu1 %v4436_v38  ;;  %v4520_v38 = vld [vmem:[#allocation5 + $0x3c4] ss:$12 sps:$4 sm:$0xff]   ;;  %p5108_p2 = pnand %p5107_p1, %p5101_p12 }
  0x82   :  { %2129 = vmatpush1.bf16.msra.mxu0 %v4437_v39  ;;  %2089 = vmatprep.subr.bf16.mxu1 %v4438_v40  ;;  %v4521_v39 = vld [vmem:[#allocation5 + $0x248] ss:$12 sps:$4 sm:$0xff]   ;;  %v4518_v40 = vld [vmem:[#allocation5 + $0x3c0] ss:$12 sps:$4 sm:$0xff]  }
  0x83   :  { %2130 = vmatprep.subr.bf16.mxu0 %v4440_v41  ;;  %v4522_v41 = vld [vmem:[#allocation5 + $0x188] ss:$12 sps:$4 sm:$0xff]  }
  0x85   :  { %2090 = vmatpush1.bf16.msra.mxu1 %v4442_v42  ;;  %v4525_v42 = vld [vmem:[#allocation5 + $0x3dc] ss:$12 sps:$4 sm:$0xff]  }
  0x86   :  { %2131 = vmatpush1.bf16.msra.mxu0 %v4443_v43  ;;  %2091 = vmatprep.subr.bf16.mxu1 %v4444_v44  ;;  %v5244_v43 = vld [vmem:[#allocation2 + $0x10] sm:$0xff] }
  0x87   :  { %2132 = vmatprep.subr.bf16.mxu0 %v4446_v45  ;;  %v4526_v44 = vld [vmem:[#allocation5 + $0x260] ss:$12 sps:$4 sm:$0xff]   ;;  %v5248_v45 = vcombine.high %v5244_v43, %v5244_v43 }
  0x89   :  { %2092 = vmatpush1.bf16.msra.mxu1 %v4448_v46  ;;  %v4523_v46 = vld [vmem:[#allocation5 + $0x3d8] ss:$12 sps:$4 sm:$0xff]  }
  0x8a   :  { %2133 = vmatpush1.bf16.msra.mxu0 %v4449_v50  ;;  %2093 = vmatprep.subr.bf16.mxu1 %v4450_v51  ;;  %v4528_v50 = vld [vmem:[#allocation5 + $0x3f0] ss:$12 sps:$4 sm:$0xff]   ;;  %v4532_v51 = vld [vmem:[#allocation5 + $0x1b8] ss:$12 sps:$4 sm:$0xff]  }
  0x8b   :  { %2134 = vmatprep.subr.bf16.mxu0 %v4452_v53  ;;  %v4535_v53 = vld [vmem:[#allocation5 + $0x40c] ss:$12 sps:$4 sm:$0xff]  }
  0x8d   :  { %2094 = vmatpush1.bf16.msra.mxu1 %v4454_v54  ;;  %v4536_v54 = vld [vmem:[#allocation5 + $0x290] ss:$12 sps:$4 sm:$0xff]  }
  0x8e   :  { %2135 = vmatpush1.bf16.msra.mxu0 %v4455_v55  ;;  %2095 = vmatprep.subr.bf16.mxu1 %v4456_v56  ;;  %v4533_v55 = vld [vmem:[#allocation5 + $0x408] ss:$12 sps:$4 sm:$0xff]   ;;  %v4537_v56 = vld [vmem:[#allocation5 + $0x1d0] ss:$12 sps:$4 sm:$0xff]  }
  0x8f   :  { %2136 = vmatprep.subr.bf16.mxu0 %v4458_v57  ;;  %v4540_v57 = vld [vmem:[#allocation5 + $0x424] ss:$12 sps:$4 sm:$0xff]  }
  0x91   :  { %2096 = vmatpush1.bf16.msra.mxu1 %v4460_v58  ;;  %v4541_v58 = vld [vmem:[#allocation5 + $0x2a8] ss:$12 sps:$4 sm:$0xff]  }
  0x92   :  { %2137 = vmatpush1.bf16.msra.mxu0 %v4461_v59  ;;  %2097 = vmatprep.subr.bf16.mxu1 %v4462_v60  ;;  %v4538_v59 = vld [vmem:[#allocation5 + $0x420] ss:$12 sps:$4 sm:$0xff]   ;;  %v4542_v60 = vld [vmem:[#allocation5 + $0x1e8] ss:$12 sps:$4 sm:$0xff]  }
  0x93   :  { %2138 = vmatprep.subr.bf16.mxu0 %v4464_v61  ;;  %v4546_v61 = vld [vmem:[#allocation5 + $0x2c0] ss:$12 sps:$4 sm:$0xff]  }
  0x95   :  { %2098 = vmatpush1.bf16.msra.mxu1 %v4466_v62  ;;  %v4543_v62 = vld [vmem:[#allocation5 + $0x438] ss:$12 sps:$4 sm:$0xff]  }
  0x96   :  { %2139 = vmatpush1.bf16.msra.mxu0 %v4467_v63  ;;  %2099 = vmatprep.subr.bf16.mxu1 %v4468_v0  ;;  %v4547_v63 = vld [vmem:[#allocation5 + $0x200] ss:$12 sps:$4 sm:$0xff]  }
  0x97   :  { %2140 = vmatprep.subr.bf16.mxu0 %v4470_v1  ;;  %v4550_v0 = vld [vmem:[#allocation5 + $0x454] ss:$12 sps:$4 sm:$0xff]   ;;  %v4551_v1 = vld [vmem:[#allocation5 + $0x2d8] ss:$12 sps:$4 sm:$0xff]  }
  0x99   :  { %2100 = vmatpush1.bf16.msra.mxu1 %v4472_v2  ;;  %v4548_v2 = vld [vmem:[#allocation5 + $0x450] ss:$12 sps:$4 sm:$0xff]  }
  0x9a   :  { %2141 = vmatpush1.bf16.msra.mxu0 %v4473_v3  ;;  %4197 = vmatprep.subr.bf16.mxu1 %v4481_v5  ;;  %v4552_v3 = vld [vmem:[#allocation5 + $0x218] ss:$12 sps:$4 sm:$0xff]   ;;  %v4556_v5 = vld [vmem:[#allocation5 + $0x2f0] ss:$12 sps:$4 sm:$0xff]  }
  0x9b   :  { %2151 = vmatprep.subr.bf16.mxu0 %v4480_v4  ;;  %v4555_v4 = vld [vmem:[#allocation5 + $0x46c] ss:$12 sps:$4 sm:$0xff]  }
  0x9c   :  { %2102 = vmatmul.mubr.bf16.vlgmr.msra.gmra.mrb[0].mxu1 %v5237_v6 }
  0x9d   :  { %2143 = vmatmul.mubr.bf16.vlgmr.msra.gmra.mrb[0].mxu0 %v5239_v7  ;;  %4198 = vmatpush3.bf16.msra.mxu1 %v4482_v9  ;;  %v4562_v9 = vld [vmem:[#allocation5 + $0x484] ss:$12 sps:$4 sm:$0xff]  }
  0x9e   :  { %2152 = vmatpush1.bf16.msra.mxu0 %v4478_v8  ;;  %4199 = vmatprep.subr.bf16.mxu1 %v4486_v11  ;;  %v4557_v8 = vld [vmem:[#allocation5 + $0x230] ss:$12 sps:$4 sm:$0xff]   ;;  %v4560_v11 = vld [vmem:[#allocation5 + $0x480] ss:$12 sps:$4 sm:$0xff]  }
  0x9f   :  { %2153 = vmatprep.subr.bf16.mxu0 %v4485_v10  ;;  %2347 = vmatprep.mubr.bf16.mxu1 %v5231_v48  ;;  %v4530_v48 = vld [vmem:[#allocation5 + $0x3f4] ss:$12 sps:$4 sm:$0xff]  }
  0xa0   :  { %2183 = vmatprep.mubr.bf16.mxu0 %v5248_v45  ;;  %v4563_v10 = vld [vmem:[#allocation5 + $0x3c8] ss:$12 sps:$4 sm:$0xff]  }
  0xa1   :  { %4200 = vmatpush3.bf16.msra.mxu1 %v4487_v13  ;;  %v4564_v13 = vld [vmem:[#allocation5 + $0x308] ss:$12 sps:$4 sm:$0xff]  }
  0xa2   :  { %2154 = vmatpush1.bf16.msra.mxu0 %v4483_v12  ;;  %4201 = vmatprep.subr.bf16.mxu1 %v4491_v15  ;;  %v5255_v12 = vcombine.low %v5244_v43, %v5244_v43  ;;  %v4568_v15 = vld [vmem:[#allocation5 + $0x3e0] ss:$12 sps:$4 sm:$0xff]   ;;  %v4602_v43 = vld [vmem:[#allocation5 + $0x544] ss:$12 sps:$4 sm:$0xff]  }
  0xa3   :  { %2155 = vmatprep.subr.bf16.mxu0 %v4490_v14  ;;  %v4567_v14 = vld [vmem:[#allocation5 + $0x49c] ss:$12 sps:$4 sm:$0xff]  }
  0xa5   :  { %4202 = vmatpush3.bf16.msra.mxu1 %v4492_v17  ;;  %v4569_v17 = vld [vmem:[#allocation5 + $0x320] ss:$12 sps:$4 sm:$0xff]  }
  0xa6   :  { %2156 = vmatpush1.bf16.msra.mxu0 %v4488_v16  ;;  %4203 = vmatprep.subr.bf16.mxu1 %v4496_v19  ;;  %v4565_v16 = vld [vmem:[#allocation5 + $0x498] ss:$12 sps:$4 sm:$0xff]  }
  0xa7   :  { %2157 = vmatprep.subr.bf16.mxu0 %v4495_v18  ;;  %v4572_v18 = vld [vmem:[#allocation5 + $0x4b4] ss:$12 sps:$4 sm:$0xff]   ;;  %v4573_v19 = vld [vmem:[#allocation5 + $0x3f8] ss:$12 sps:$4 sm:$0xff]  }
  0xa9   :  { %4204 = vmatpush3.bf16.msra.mxu1 %v4497_v21  ;;  %v4574_v21 = vld [vmem:[#allocation5 + $0x338] ss:$12 sps:$4 sm:$0xff]  }
  0xaa   :  { %2158 = vmatpush1.bf16.msra.mxu0 %v4493_v20  ;;  %4205 = vmatprep.subr.bf16.mxu1 %v4501_v23  ;;  %v4570_v20 = vld [vmem:[#allocation5 + $0x4b0] ss:$12 sps:$4 sm:$0xff]  }
  0xab   :  { %2159 = vmatprep.subr.bf16.mxu0 %v4500_v22  ;;  %v4577_v22 = vld [vmem:[#allocation5 + $0x4cc] ss:$12 sps:$4 sm:$0xff]   ;;  %v4578_v23 = vld [vmem:[#allocation5 + $0x410] ss:$12 sps:$4 sm:$0xff]  }
  0xad   :  { %4206 = vmatpush3.bf16.msra.mxu1 %v4502_v25  ;;  %v4582_v25 = vld [vmem:[#allocation5 + $0x4e4] ss:$12 sps:$4 sm:$0xff]  }
  0xae   :  { %2160 = vmatpush1.bf16.msra.mxu0 %v4498_v24  ;;  %4207 = vmatprep.subr.bf16.mxu1 %v4506_v27  ;;  %v4575_v24 = vld [vmem:[#allocation5 + $0x4c8] ss:$12 sps:$4 sm:$0xff]   ;;  %v4580_v27 = vld [vmem:[#allocation5 + $0x4e0] ss:$12 sps:$4 sm:$0xff]  }
  0xaf   :  { %2161 = vmatprep.subr.bf16.mxu0 %v4505_v26  ;;  %v4583_v26 = vld [vmem:[#allocation5 + $0x428] ss:$12 sps:$4 sm:$0xff]  }
  0xb1   :  { %4208 = vmatpush3.bf16.msra.mxu1 %v4507_v29  ;;  %v4587_v29 = vld [vmem:[#allocation5 + $0x4fc] ss:$12 sps:$4 sm:$0xff]  }
  0xb2   :  { %2162 = vmatpush1.bf16.msra.mxu0 %v4503_v28  ;;  %4209 = vmatprep.subr.bf16.mxu1 %v4511_v31  ;;  %v4584_v28 = vld [vmem:[#allocation5 + $0x368] ss:$12 sps:$4 sm:$0xff]   ;;  %v4585_v31 = vld [vmem:[#allocation5 + $0x4f8] ss:$12 sps:$4 sm:$0xff]  }
  0xb3   :  { %2163 = vmatprep.subr.bf16.mxu0 %v4510_v30  ;;  %v4588_v30 = vld [vmem:[#allocation5 + $0x440] ss:$12 sps:$4 sm:$0xff]  }
  0xb5   :  { %4210 = vmatpush3.bf16.msra.mxu1 %v4512_v33  ;;  %v4592_v33 = vld [vmem:[#allocation5 + $0x514] ss:$12 sps:$4 sm:$0xff]  }
  0xb6   :  { %2164 = vmatpush1.bf16.msra.mxu0 %v4508_v32  ;;  %4211 = vmatprep.subr.bf16.mxu1 %v4516_v35  ;;  %v4589_v32 = vld [vmem:[#allocation5 + $0x380] ss:$12 sps:$4 sm:$0xff]  }
  0xb7   :  { %2165 = vmatprep.subr.bf16.mxu0 %v4515_v34  ;;  %v4593_v34 = vld [vmem:[#allocation5 + $0x458] ss:$12 sps:$4 sm:$0xff]   ;;  %v5260_v35 = vld [vmem:[#allocation2 + $0x18] sm:$0xff] }
  0xb9   :  { %4212 = vmatpush3.bf16.msra.mxu1 %v4517_v37  ;;  %v4594_v37 = vld [vmem:[#allocation5 + $0x398] ss:$12 sps:$4 sm:$0xff]  }
  0xba   :  { %2166 = vmatpush1.bf16.msra.mxu0 %v4513_v36  ;;  %4219 = vmatprep.subr.bf16.mxu1 %v4521_v39  ;;  %v4590_v36 = vld [vmem:[#allocation5 + $0x510] ss:$12 sps:$4 sm:$0xff]   ;;  %v4597_v39 = vld [vmem:[#allocation5 + $0x52c] ss:$12 sps:$4 sm:$0xff]  }
  0xbb   :  { %2167 = vmatprep.subr.bf16.mxu0 %v4520_v38  ;;  %v3754_v38 = vcombine.high %v5260_v35, %v5260_v35 }
  0xbc   :  { %2348 = vmatmul.mubr.bf16.vlgmr.msra.gmra.mrb[4].mxu1 %v5237_v6  ;;  %v4553_v6 = vld [vmem:[#allocation5 + $0x468] ss:$12 sps:$4 sm:$0xff]  }
  0xbd   :  { %4220 = vmatpush3.bf16.msra.mxu1 %v4522_v41  ;;  %2387 = vmatprep.mubr.bf16.mxu1 %v5233_v52  ;;  %v4545_v52 = vld [vmem:[#allocation5 + $0x43c] ss:$12 sps:$4 sm:$0xff]  }
  0xbe   :  { %2168 = vmatpush1.bf16.msra.mxu0 %v4518_v40  ;;  %4221 = vmatprep.subr.bf16.mxu1 %v4526_v44  ;;  %v4598_v40 = vld [vmem:[#allocation5 + $0x470] ss:$12 sps:$4 sm:$0xff]   ;;  %v4595_v41 = vld [vmem:[#allocation5 + $0x528] ss:$12 sps:$4 sm:$0xff]  }
  0xbf   :  { %2169 = vmatprep.subr.bf16.mxu0 %v4525_v42  ;;  %v4599_v42 = vld [vmem:[#allocation5 + $0x3b0] ss:$12 sps:$4 sm:$0xff]   ;;  %v4603_v44 = vld [vmem:[#allocation5 + $0x548] ss:$12 sps:$4 sm:$0xff]  }
  0xc1   :  { %4222 = vmatpush3.bf16.msra.mxu1 %v4527_v47  ;;  %v4607_v47 = vld [vmem:[#allocation5 + $0x55c] ss:$12 sps:$4 sm:$0xff]  }
  0xc2   :  { %2170 = vmatpush1.bf16.msra.mxu0 %v4523_v46  ;;  %4223 = vmatprep.subr.bf16.mxu1 %v4531_v49  ;;  %v4604_v46 = vld [vmem:[#allocation5 + $0x488] ss:$12 sps:$4 sm:$0xff]   ;;  %v4605_v49 = vld [vmem:[#allocation5 + $0x558] ss:$12 sps:$4 sm:$0xff]  }
  0xc3   :  { %2171 = vmatprep.subr.bf16.mxu0 %v4530_v48  ;;  %v4608_v48 = vld [vmem:[#allocation5 + $0x560] ss:$12 sps:$4 sm:$0xff]  }
  0xc5   :  { %4224 = vmatpush3.bf16.msra.mxu1 %v4532_v51  ;;  %v4612_v51 = vld [vmem:[#allocation5 + $0x574] ss:$12 sps:$4 sm:$0xff]  }
  0xc6   :  { %2172 = vmatpush1.bf16.msra.mxu0 %v4528_v50  ;;  %4225 = vmatprep.subr.bf16.mxu1 %v4536_v54  ;;  %v4609_v50 = vld [vmem:[#allocation5 + $0x4a0] ss:$12 sps:$4 sm:$0xff]   ;;  %v4610_v54 = vld [vmem:[#allocation5 + $0x570] ss:$12 sps:$4 sm:$0xff]  }
  0xc7   :  { %2173 = vmatprep.subr.bf16.mxu0 %v4535_v53  ;;  %v4613_v53 = vld [vmem:[#allocation5 + $0x578] ss:$12 sps:$4 sm:$0xff]  }
  0xc9   :  { %4226 = vmatpush3.bf16.msra.mxu1 %v4537_v56  ;;  %v4617_v56 = vld [vmem:[#allocation5 + $0x58c] ss:$12 sps:$4 sm:$0xff]  }
  0xca   :  { %2174 = vmatpush1.bf16.msra.mxu0 %v4533_v55  ;;  %4227 = vmatprep.subr.bf16.mxu1 %v4541_v58  ;;  %v4614_v55 = vld [vmem:[#allocation5 + $0x4b8] ss:$12 sps:$4 sm:$0xff]   ;;  %v4615_v58 = vld [vmem:[#allocation5 + $0x588] ss:$12 sps:$4 sm:$0xff]  }
  0xcb   :  { %2175 = vmatprep.subr.bf16.mxu0 %v4540_v57  ;;  %v4618_v57 = vld [vmem:[#allocation5 + $0x590] ss:$12 sps:$4 sm:$0xff]  }
  0xcd   :  { %4228 = vmatpush3.bf16.msra.mxu1 %v4542_v60  ;;  %v4622_v60 = vld [vmem:[#allocation5 + $0x5a4] ss:$12 sps:$4 sm:$0xff]  }
  0xce   :  { %2176 = vmatpush1.bf16.msra.mxu0 %v4538_v59  ;;  %4229 = vmatprep.subr.bf16.mxu1 %v4546_v61  ;;  %v4619_v59 = vld [vmem:[#allocation5 + $0x4d0] ss:$12 sps:$4 sm:$0xff]   ;;  %v4620_v61 = vld [vmem:[#allocation5 + $0x5a0] ss:$12 sps:$4 sm:$0xff]  }
  0xcf   :  { %2177 = vmatprep.subr.bf16.mxu0 %v4545_v52  ;;  %v4623_v52 = vld [vmem:[#allocation5 + $0x5a8] ss:$12 sps:$4 sm:$0xff]  }
  0xd1   :  { %4230 = vmatpush3.bf16.msra.mxu1 %v4547_v63  ;;  %v4627_v63 = vld [vmem:[#allocation5 + $0x5bc] ss:$12 sps:$4 sm:$0xff]  }
  0xd2   :  { %2178 = vmatpush1.bf16.msra.mxu0 %v4543_v62  ;;  %4231 = vmatprep.subr.bf16.mxu1 %v4551_v1  ;;  %v4624_v62 = vld [vmem:[#allocation5 + $0x4e8] ss:$12 sps:$4 sm:$0xff]   ;;  %v4625_v1 = vld [vmem:[#allocation5 + $0x5b8] ss:$12 sps:$4 sm:$0xff]  }
  0xd3   :  { %2179 = vmatprep.subr.bf16.mxu0 %v4550_v0  ;;  %v4628_v0 = vld [vmem:[#allocation5 + $0x5c0] ss:$12 sps:$4 sm:$0xff]  }
  0xd5   :  { %4232 = vmatpush3.bf16.msra.mxu1 %v4552_v3  ;;  %v4632_v3 = vld [vmem:[#allocation5 + $0x5d4] ss:$12 sps:$4 sm:$0xff]  }
  0xd6   :  { %2180 = vmatpush1.bf16.msra.mxu0 %v4548_v2  ;;  %4233 = vmatprep.subr.bf16.mxu1 %v4556_v5  ;;  %v4629_v2 = vld [vmem:[#allocation5 + $0x500] ss:$12 sps:$4 sm:$0xff]   ;;  %v4630_v5 = vld [vmem:[#allocation5 + $0x5d0] ss:$12 sps:$4 sm:$0xff]  }
  0xd7   :  { %2181 = vmatprep.subr.bf16.mxu0 %v4555_v4  ;;  %v4633_v4 = vld [vmem:[#allocation5 + $0x5d8] ss:$12 sps:$4 sm:$0xff]  }
  0xd9   :  { %4234 = vmatpush3.bf16.msra.mxu1 %v4557_v8  ;;  %v4637_v8 = vld [vmem:[#allocation5 + $0x5ec] ss:$12 sps:$4 sm:$0xff]  }
  0xda   :  { %2182 = vmatpush1.bf16.msra.mxu0 %v4553_v6  ;;  %4241 = vmatprep.subr.bf16.mxu1 %v4563_v10  ;;  %v4634_v6 = vld [vmem:[#allocation5 + $0x518] ss:$12 sps:$4 sm:$0xff]   ;;  %v4635_v10 = vld [vmem:[#allocation5 + $0x5e8] ss:$12 sps:$4 sm:$0xff]  }
  0xdb   :  { %2192 = vmatprep.subr.bf16.mxu0 %v4562_v9  ;;  %v4638_v9 = vld [vmem:[#allocation5 + $0x5f0] ss:$12 sps:$4 sm:$0xff]  }
  0xdc   :  { %2388 = vmatmul.mubr.bf16.vlgmr.msra.gmra.mrb[8].mxu1 %v5239_v7  ;;  %v4579_v7 = vld [vmem:[#allocation5 + $0x350] ss:$12 sps:$4 sm:$0xff]  }
  0xdd   :  { %2184 = vmatmul.mubr.bf16.vlgmr.msra.gmra.mrb[0].mxu0 %v5255_v12  ;;  %4242 = vmatpush3.bf16.msra.mxu1 %v4564_v13  ;;  %v4645_v13 = vld [vmem:[#allocation5 + $0x6c8] ss:$12 sps:$4 sm:$0xff]  }
  0xde   :  { %2193 = vmatpush1.bf16.msra.mxu0 %v4560_v11  ;;  %4243 = vmatprep.subr.bf16.mxu1 %v4568_v15  ;;  %v4639_v11 = vld [vmem:[#allocation5 + $0x530] ss:$12 sps:$4 sm:$0xff]   ;;  %v4646_v15 = vld [vmem:[#allocation5 + $0x608] ss:$12 sps:$4 sm:$0xff]  }
  0xdf   :  { %2194 = vmatprep.subr.bf16.mxu0 %v4567_v14  ;;  %2427 = vmatprep.mubr.bf16.mxu1 %v5248_v45  ;;  %v4600_v45 = vld [vmem:[#allocation5 + $0x540] ss:$12 sps:$4 sm:$0xff]  }
  0xe0   :  { %2224 = vmatprep.mubr.bf16.mxu0 %v3754_v38  ;;  %v4642_v14 = vld [vmem:[#allocation5 + $0x600] ss:$12 sps:$4 sm:$0xff]  }
  0xe1   :  { %4244 = vmatpush3.bf16.msra.mxu1 %v4569_v17  ;;  %v5267_v17 = vld [vmem:[#allocation2 + $0x20] sm:$0xff] }
  0xe2   :  { %2195 = vmatpush1.bf16.msra.mxu0 %v4565_v16  ;;  %4245 = vmatprep.subr.bf16.mxu1 %v4573_v19  ;;  %v3753_v16 = vcombine.low %v5260_v35, %v5260_v35  ;;  %v4650_v19 = vld [vmem:[#allocation5 + $0x6e0] ss:$12 sps:$4 sm:$0xff]  }
  0xe3   :  { %2196 = vmatprep.subr.bf16.mxu0 %v4572_v18  ;;  %v4649_v18 = vld [vmem:[#allocation5 + $0x61c] ss:$12 sps:$4 sm:$0xff]   ;;  %v4670_v35 = vld [vmem:[#allocation5 + $0x740] ss:$12 sps:$4 sm:$0xff]  }
  0xe5   :  { %4246 = vmatpush3.bf16.msra.mxu1 %v4574_v21  ;;  %v4647_v21 = vld [vmem:[#allocation5 + $0x618] ss:$12 sps:$4 sm:$0xff]  }
  0xe6   :  { %2197 = vmatpush1.bf16.msra.mxu0 %v4570_v20  ;;  %4247 = vmatprep.subr.bf16.mxu1 %v4578_v23  ;;  %v3756_v20 = vcombine.high %v5267_v17, %v5267_v17  ;;  %v4654_v23 = vld [vmem:[#allocation5 + $0x634] ss:$12 sps:$4 sm:$0xff]  }
  0xe7   :  { %2198 = vmatprep.subr.bf16.mxu0 %v4577_v22  ;;  %v4651_v22 = vld [vmem:[#allocation5 + $0x620] ss:$12 sps:$4 sm:$0xff]  }
  0xe9   :  { %4248 = vmatpush3.bf16.msra.mxu1 %v4579_v7  ;;  %v4652_v7 = vld [vmem:[#allocation5 + $0x630] ss:$12 sps:$4 sm:$0xff]  }
  0xea   :  { %2199 = vmatpush1.bf16.msra.mxu0 %v4575_v24  ;;  %4249 = vmatprep.subr.bf16.mxu1 %v4583_v26  ;;  %v4655_v24 = vld [vmem:[#allocation5 + $0x6f8] ss:$12 sps:$4 sm:$0xff]  }
  0xeb   :  { %2200 = vmatprep.subr.bf16.mxu0 %v4582_v25  ;;  %v4656_v25 = vld [vmem:[#allocation5 + $0x638] ss:$12 sps:$4 sm:$0xff]  }
  0xec   :  { %v4659_v26 = vld [vmem:[#allocation5 + $0x64c] ss:$12 sps:$4 sm:$0xff]  }
  0xed   :  { %4250 = vmatpush3.bf16.msra.mxu1 %v4584_v28  ;;  %v4657_v28 = vld [vmem:[#allocation5 + $0x648] ss:$12 sps:$4 sm:$0xff]  }
  0xee   :  { %2201 = vmatpush1.bf16.msra.mxu0 %v4580_v27  ;;  %4251 = vmatprep.subr.bf16.mxu1 %v4588_v30  ;;  %v4660_v27 = vld [vmem:[#allocation5 + $0x710] ss:$12 sps:$4 sm:$0xff]  }
  0xef   :  { %2202 = vmatprep.subr.bf16.mxu0 %v4587_v29  ;;  %v4661_v29 = vld [vmem:[#allocation5 + $0x650] ss:$12 sps:$4 sm:$0xff]  }
  0xf0   :  { %v4664_v30 = vld [vmem:[#allocation5 + $0x664] ss:$12 sps:$4 sm:$0xff]  }
  0xf1   :  { %4252 = vmatpush3.bf16.msra.mxu1 %v4589_v32  ;;  %v4662_v32 = vld [vmem:[#allocation5 + $0x660] ss:$12 sps:$4 sm:$0xff]  }
  0xf2   :  { %2203 = vmatpush1.bf16.msra.mxu0 %v4585_v31  ;;  %4253 = vmatprep.subr.bf16.mxu1 %v4593_v34  ;;  %v4665_v31 = vld [vmem:[#allocation5 + $0x728] ss:$12 sps:$4 sm:$0xff]  }
  0xf3   :  { %2204 = vmatprep.subr.bf16.mxu0 %v4592_v33  ;;  %v4666_v33 = vld [vmem:[#allocation5 + $0x668] ss:$12 sps:$4 sm:$0xff]  }
  0xf4   :  { %v4669_v34 = vld [vmem:[#allocation5 + $0x67c] ss:$12 sps:$4 sm:$0xff]  }
  0xf5   :  { %4254 = vmatpush3.bf16.msra.mxu1 %v4594_v37  ;;  %v4671_v37 = vld [vmem:[#allocation5 + $0x680] ss:$12 sps:$4 sm:$0xff]  }
  0xf6   :  { %2205 = vmatpush1.bf16.msra.mxu0 %v4590_v36  ;;  %4255 = vmatprep.subr.bf16.mxu1 %v4598_v40  ;;  %v4667_v36 = vld [vmem:[#allocation5 + $0x678] ss:$12 sps:$4 sm:$0xff]   ;;  %v4672_v40 = vld [vmem:[#allocation5 + $0x690] ss:$12 sps:$4 sm:$0xff]  }
  0xf7   :  { %2206 = vmatprep.subr.bf16.mxu0 %v4597_v39  ;;  %v4675_v39 = vld [vmem:[#allocation5 + $0x758] ss:$12 sps:$4 sm:$0xff]  }
  0xf9   :  { %4256 = vmatpush3.bf16.msra.mxu1 %v4599_v42  ;;  %v4679_v42 = vld [vmem:[#allocation5 + $0x6ac] ss:$12 sps:$4 sm:$0xff]  }
  0xfa   :  { %2207 = vmatpush1.bf16.msra.mxu0 %v4595_v41  ;;  %4263 = vmatprep.subr.bf16.mxu1 %v4603_v44  ;;  %v4676_v41 = vld [vmem:[#allocation5 + $0x698] ss:$12 sps:$4 sm:$0xff]   ;;  %v4677_v44 = vld [vmem:[#allocation5 + $0x6a8] ss:$12 sps:$4 sm:$0xff]  }
  0xfb   :  { %2208 = vmatprep.subr.bf16.mxu0 %v4602_v43  ;;  %v4680_v43 = vld [vmem:[#allocation5 + $0x770] ss:$12 sps:$4 sm:$0xff]  }
  0xfc   :  { %2428 = vmatmul.mubr.bf16.vlgmr.msra.gmra.mrb[12].mxu1 %v5255_v12  ;;  %v4644_v12 = vld [vmem:[#allocation5 + $0x604] ss:$12 sps:$4 sm:$0xff]  }
  0xfd   :  { %4264 = vmatpush3.bf16.msra.mxu1 %v4604_v46  ;;  %2467 = vmatprep.mubr.bf16.mxu1 %v3754_v38  ;;  %v4674_v38 = vld [vmem:[#allocation5 + $0x694] ss:$12 sps:$4 sm:$0xff]   ;;  %v4686_v46 = vld [vmem:[#allocation5 + $0x6c4] ss:$12 sps:$4 sm:$0xff]  }
  0xfe   :  { %2209 = vmatpush1.bf16.msra.mxu0 %v4600_v45  ;;  %4265 = vmatprep.subr.bf16.mxu1 %v4608_v48  ;;  %v4681_v45 = vld [vmem:[#allocation5 + $0x6b0] ss:$12 sps:$4 sm:$0xff]   ;;  %v5273_v48 = vcombine.low %v5267_v17, %v5267_v17 }
  0xff   :  { %2210 = vmatprep.subr.bf16.mxu0 %v4607_v47  ;;  %v4687_v47 = vld [vmem:[#allocation5 + $0x848] ss:$12 sps:$4 sm:$0xff]   ;;  %v4723_v17 = vld [vmem:[#allocation5 + $0x830] ss:$12 sps:$4 sm:$0xff]  }
 0x101   :  { %4266 = vmatpush3.bf16.msra.mxu1 %v4609_v50  ;;  %v4684_v50 = vld [vmem:[#allocation5 + $0x6c0] ss:$12 sps:$4 sm:$0xff]  }
 0x102   :  { %2211 = vmatpush1.bf16.msra.mxu0 %v4605_v49  ;;  %4267 = vmatprep.subr.bf16.mxu1 %v4613_v53  ;;  %v5275_v49 = vld [vmem:[#allocation2 + $0x28] sm:$0xff] }
 0x103   :  { %2212 = vmatprep.subr.bf16.mxu0 %v4612_v51  ;;  %v4688_v51 = vld [vmem:[#allocation5 + $0x788] ss:$12 sps:$4 sm:$0xff]  }
 0x104   :  { %v4691_v53 = vld [vmem:[#allocation5 + $0x6dc] ss:$12 sps:$4 sm:$0xff]  }
 0x105   :  { %4268 = vmatpush3.bf16.msra.mxu1 %v4614_v55  ;;  %v4689_v55 = vld [vmem:[#allocation5 + $0x6d8] ss:$12 sps:$4 sm:$0xff]  }
 0x106   :  { %2213 = vmatpush1.bf16.msra.mxu0 %v4610_v54  ;;  %4269 = vmatprep.subr.bf16.mxu1 %v4618_v57  ;;  %v4692_v54 = vld [vmem:[#allocation5 + $0x860] ss:$12 sps:$4 sm:$0xff]   ;;  %v5279_v57 = vcombine.high %v5275_v49, %v5275_v49 }
 0x107   :  { %2214 = vmatprep.subr.bf16.mxu0 %v4617_v56  ;;  %v4693_v56 = vld [vmem:[#allocation5 + $0x7a0] ss:$12 sps:$4 sm:$0xff]  }
 0x109   :  { %4270 = vmatpush3.bf16.msra.mxu1 %v4619_v59  ;;  %v4697_v59 = vld [vmem:[#allocation5 + $0x878] ss:$12 sps:$4 sm:$0xff]  }
 0x10a   :  { %2215 = vmatpush1.bf16.msra.mxu0 %v4615_v58  ;;  %4271 = vmatprep.subr.bf16.mxu1 %v4623_v52  ;;  %v4696_v58 = vld [vmem:[#allocation5 + $0x6f4] ss:$12 sps:$4 sm:$0xff]   ;;  %v4698_v52 = vld [vmem:[#allocation5 + $0x7b8] ss:$12 sps:$4 sm:$0xff]  }
 0x10b   :  { %2216 = vmatprep.subr.bf16.mxu0 %v4622_v60  ;;  %v4694_v60 = vld [vmem:[#allocation5 + $0x6f0] ss:$12 sps:$4 sm:$0xff]  }
 0x10d   :  { %4272 = vmatpush3.bf16.msra.mxu1 %v4624_v62  ;;  %v4702_v62 = vld [vmem:[#allocation5 + $0x890] ss:$12 sps:$4 sm:$0xff]  }
 0x10e   :  { %2217 = vmatpush1.bf16.msra.mxu0 %v4620_v61  ;;  %4273 = vmatprep.subr.bf16.mxu1 %v4628_v0  ;;  %v4701_v61 = vld [vmem:[#allocation5 + $0x70c] ss:$12 sps:$4 sm:$0xff]   ;;  %v4703_v0 = vld [vmem:[#allocation5 + $0x7d0] ss:$12 sps:$4 sm:$0xff]  }
 0x10f   :  { %2218 = vmatprep.subr.bf16.mxu0 %v4627_v63  ;;  %v4699_v63 = vld [vmem:[#allocation5 + $0x708] ss:$12 sps:$4 sm:$0xff]  }
 0x111   :  { %4274 = vmatpush3.bf16.msra.mxu1 %v4629_v2  ;;  %v4707_v2 = vld [vmem:[#allocation5 + $0x8a8] ss:$12 sps:$4 sm:$0xff]  }
 0x112   :  { %2219 = vmatpush1.bf16.msra.mxu0 %v4625_v1  ;;  %4275 = vmatprep.subr.bf16.mxu1 %v4633_v4  ;;  %v4706_v1 = vld [vmem:[#allocation5 + $0x724] ss:$12 sps:$4 sm:$0xff]   ;;  %v4708_v4 = vld [vmem:[#allocation5 + $0x7e8] ss:$12 sps:$4 sm:$0xff]  }
 0x113   :  { %2220 = vmatprep.subr.bf16.mxu0 %v4632_v3  ;;  %v4704_v3 = vld [vmem:[#allocation5 + $0x720] ss:$12 sps:$4 sm:$0xff]  }
 0x115   :  { %4276 = vmatpush3.bf16.msra.mxu1 %v4634_v6  ;;  %v4712_v6 = vld [vmem:[#allocation5 + $0x8c0] ss:$12 sps:$4 sm:$0xff]  }
 0x116   :  { %2221 = vmatpush1.bf16.msra.mxu0 %v4630_v5  ;;  %4277 = vmatprep.subr.bf16.mxu1 %v4638_v9  ;;  %v4711_v5 = vld [vmem:[#allocation5 + $0x73c] ss:$12 sps:$4 sm:$0xff]   ;;  %v4713_v9 = vld [vmem:[#allocation5 + $0x800] ss:$12 sps:$4 sm:$0xff]  }
 0x117   :  { %2222 = vmatprep.subr.bf16.mxu0 %v4637_v8  ;;  %v4709_v8 = vld [vmem:[#allocation5 + $0x738] ss:$12 sps:$4 sm:$0xff]  }
 0x119   :  { %4278 = vmatpush3.bf16.msra.mxu1 %v4639_v11  ;;  %v4717_v11 = vld [vmem:[#allocation5 + $0x8d8] ss:$12 sps:$4 sm:$0xff]  }
 0x11a   :  { %2223 = vmatpush1.bf16.msra.mxu0 %v4635_v10  ;;  %4285 = vmatprep.subr.bf16.mxu1 %v4645_v13  ;;  %v4716_v10 = vld [vmem:[#allocation5 + $0x754] ss:$12 sps:$4 sm:$0xff]   ;;  %v4718_v13 = vld [vmem:[#allocation5 + $0x818] ss:$12 sps:$4 sm:$0xff]  }
 0x11b   :  { %2233 = vmatprep.subr.bf16.mxu0 %v4644_v12  ;;  %v4714_v12 = vld [vmem:[#allocation5 + $0x750] ss:$12 sps:$4 sm:$0xff]  }
 0x11c   :  { %2468 = vmatmul.mubr.bf16.vlgmr.msra.gmra.mrb[16].mxu1 %v3753_v16 }
 0x11d   :  { %2225 = vmatmul.mubr.bf16.vlgmr.msra.gmra.mrb[0].mxu0 %v3753_v16  ;;  %4286 = vmatpush3.bf16.msra.mxu1 %v4646_v15  ;;  %v4722_v15 = vld [vmem:[#allocation5 + $0x8f0] ss:$12 sps:$4 sm:$0xff]   ;;  %v4719_v16 = vld [vmem:[#allocation5 + $0x768] ss:$12 sps:$4 sm:$0xff]  }
 0x11e   :  { %2234 = vmatpush1.bf16.msra.mxu0 %v4642_v14  ;;  %4287 = vmatprep.subr.bf16.mxu1 %v4650_v19  ;;  %v4721_v14 = vld [vmem:[#allocation5 + $0x76c] ss:$12 sps:$4 sm:$0xff]  }
 0x11f   :  { %2235 = vmatprep.subr.bf16.mxu0 %v4649_v18  ;;  %2507 = vmatprep.mubr.bf16.mxu1 %v3756_v20  ;;  %v4728_v18 = vld [vmem:[#allocation5 + $0x784] ss:$12 sps:$4 sm:$0xff]   ;;  %v4726_v19 = vld [vmem:[#allocation5 + $0x780] ss:$12 sps:$4 sm:$0xff]  }
 0x120   :  { %2265 = vmatprep.mubr.bf16.mxu0 %v3756_v20  ;;  %v5285_v20 = vcombine.low %v5275_v49, %v5275_v49  ;;  %v4765_v49 = vld [vmem:[#allocation5 + $0x8b8] ss:$12 sps:$4 sm:$0xff]  }
 0x121   :  { %4288 = vmatpush3.bf16.msra.mxu1 %v4651_v22  ;;  %v4729_v22 = vld [vmem:[#allocation5 + $0x798] ss:$12 sps:$4 sm:$0xff]  }
 0x122   :  { %2236 = vmatpush1.bf16.msra.mxu0 %v4647_v21  ;;  %4289 = vmatprep.subr.bf16.mxu1 %v4655_v24  ;;  %v4731_v21 = vld [vmem:[#allocation5 + $0x79c] ss:$12 sps:$4 sm:$0xff]  }
 0x123   :  { %2237 = vmatprep.subr.bf16.mxu0 %v4654_v23  ;;  %v4734_v23 = vld [vmem:[#allocation5 + $0x7b4] ss:$12 sps:$4 sm:$0xff]   ;;  %v4732_v24 = vld [vmem:[#allocation5 + $0x7b0] ss:$12 sps:$4 sm:$0xff]  }
 0x125   :  { %4290 = vmatpush3.bf16.msra.mxu1 %v4656_v25  ;;  %v4735_v25 = vld [vmem:[#allocation5 + $0x7c8] ss:$12 sps:$4 sm:$0xff]  }
 0x126   :  { %2238 = vmatpush1.bf16.msra.mxu0 %v4652_v7  ;;  %4291 = vmatprep.subr.bf16.mxu1 %v4660_v27  ;;  %v4737_v7 = vld [vmem:[#allocation5 + $0x7cc] ss:$12 sps:$4 sm:$0xff]  }
 0x127   :  { %2239 = vmatprep.subr.bf16.mxu0 %v4659_v26  ;;  %v4740_v26 = vld [vmem:[#allocation5 + $0x7e4] ss:$12 sps:$4 sm:$0xff]   ;;  %v4738_v27 = vld [vmem:[#allocation5 + $0x7e0] ss:$12 sps:$4 sm:$0xff]  }
 0x129   :  { %4292 = vmatpush3.bf16.msra.mxu1 %v4661_v29  ;;  %v4741_v29 = vld [vmem:[#allocation5 + $0x7f8] ss:$12 sps:$4 sm:$0xff]  }
 0x12a   :  { %2240 = vmatpush1.bf16.msra.mxu0 %v4657_v28  ;;  %4293 = vmatprep.subr.bf16.mxu1 %v4665_v31  ;;  %v4743_v28 = vld [vmem:[#allocation5 + $0x7fc] ss:$12 sps:$4 sm:$0xff]  }
 0x12b   :  { %2241 = vmatprep.subr.bf16.mxu0 %v4664_v30  ;;  %v4746_v30 = vld [vmem:[#allocation5 + $0x814] ss:$12 sps:$4 sm:$0xff]  }
 0x12d   :  { %4294 = vmatpush3.bf16.msra.mxu1 %v4666_v33  ;;  %v4744_v33 = vld [vmem:[#allocation5 + $0x810] ss:$12 sps:$4 sm:$0xff]  }
 0x12e   :  { %2242 = vmatpush1.bf16.msra.mxu0 %v4662_v32  ;;  %4295 = vmatprep.subr.bf16.mxu1 %v4670_v35  ;;  %v4749_v35 = vld [vmem:[#allocation5 + $0x82c] ss:$12 sps:$4 sm:$0xff]  }
 0x12f   :  { %2243 = vmatprep.subr.bf16.mxu0 %v4669_v34 }
 0x131   :  { %4296 = vmatpush3.bf16.msra.mxu1 %v4671_v37  ;;  %v4747_v37 = vld [vmem:[#allocation5 + $0x828] ss:$12 sps:$4 sm:$0xff]  }
 0x132   :  { %2244 = vmatpush1.bf16.msra.mxu0 %v4667_v36  ;;  %4297 = vmatprep.subr.bf16.mxu1 %v4675_v39  ;;  %v4750_v39 = vld [vmem:[#allocation5 + $0x840] ss:$12 sps:$4 sm:$0xff]  }
 0x133   :  { %2245 = vmatprep.subr.bf16.mxu0 %v4674_v38  ;;  %v4752_v38 = vld [vmem:[#allocation5 + $0x844] ss:$12 sps:$4 sm:$0xff]  }
 0x135   :  { %4298 = vmatpush3.bf16.msra.mxu1 %v4676_v41  ;;  %v4753_v41 = vld [vmem:[#allocation5 + $0x858] ss:$12 sps:$4 sm:$0xff]  }
 0x136   :  { %2246 = vmatpush1.bf16.msra.mxu0 %v4672_v40  ;;  %4299 = vmatprep.subr.bf16.mxu1 %v4680_v43  ;;  %v4755_v40 = vld [vmem:[#allocation5 + $0x85c] ss:$12 sps:$4 sm:$0xff]  }
 0x137   :  { %2247 = vmatprep.subr.bf16.mxu0 %v4679_v42  ;;  %v4758_v42 = vld [vmem:[#allocation5 + $0x874] ss:$12 sps:$4 sm:$0xff]   ;;  %v4756_v43 = vld [vmem:[#allocation5 + $0x870] ss:$12 sps:$4 sm:$0xff]  }
 0x139   :  { %4300 = vmatpush3.bf16.msra.mxu1 %v4681_v45  ;;  %v4759_v45 = vld [vmem:[#allocation5 + $0x888] ss:$12 sps:$4 sm:$0xff]  }
 0x13a   :  { %2248 = vmatpush1.bf16.msra.mxu0 %v4677_v44  ;;  %4307 = vmatprep.subr.bf16.mxu1 %v4687_v47  ;;  %v4761_v44 = vld [vmem:[#allocation5 + $0x88c] ss:$12 sps:$4 sm:$0xff]  }
 0x13b   :  { %2249 = vmatprep.subr.bf16.mxu0 %v4686_v46  ;;  %v4764_v46 = vld [vmem:[#allocation5 + $0x8a4] ss:$12 sps:$4 sm:$0xff]   ;;  %v4762_v47 = vld [vmem:[#allocation5 + $0x8a0] ss:$12 sps:$4 sm:$0xff]  }
 0x13c   :  { %2508 = vmatmul.mubr.bf16.vlgmr.msra.gmra.mrb[20].mxu1 %v5273_v48 }
 0x13d   :  { %4308 = vmatpush3.bf16.msra.mxu1 %v4688_v51  ;;  %2547 = vmatprep.mubr.bf16.mxu1 %v5279_v57 }
 0x13e   :  { %2250 = vmatpush1.bf16.msra.mxu0 %v4684_v50  ;;  %4309 = vmatprep.subr.bf16.mxu1 %v4692_v54  ;;  %v4770_v50 = vld [vmem:[#allocation5 + $0x8d4] ss:$12 sps:$4 sm:$0xff]   ;;  %v4768_v54 = vld [vmem:[#allocation5 + $0x8d0] ss:$12 sps:$4 sm:$0xff]  }
 0x13f   :  { %2251 = vmatprep.subr.bf16.mxu0 %v4691_v53 }
 0x141   :  { %4310 = vmatpush3.bf16.msra.mxu1 %v4693_v56 }
 0x142   :  { %2252 = vmatpush1.bf16.msra.mxu0 %v4689_v55  ;;  %4311 = vmatprep.subr.bf16.mxu1 %v4697_v59  ;;  %v4771_v59 = vld [vmem:[#allocation5 + $0x8e8] ss:$12 sps:$4 sm:$0xff]  }
 0x143   :  { %2253 = vmatprep.subr.bf16.mxu0 %v4696_v58 }
 0x145   :  { %4312 = vmatpush3.bf16.msra.mxu1 %v4698_v52 }
 0x146   :  { %2254 = vmatpush1.bf16.msra.mxu0 %v4694_v60  ;;  %4313 = vmatprep.subr.bf16.mxu1 %v4702_v62  ;;  %v476_v60 = vlaneseq  ;;  %v5298_v62 = vld [vmem:[#allocation7] sm:$0x7] }
 0x147   :  { %2255 = vmatprep.subr.bf16.mxu0 %v4701_v61 }
 0x148   :  { %v5295_v52 = vshrl.u32 %v476_v60, 7  ;;  %v4842_v60 = vld [vmem:[#allocation8 + $0x214] ss:$24 sps:$4 sm:$0xff]  }
 0x149   :  { %4314 = vmatpush3.bf16.msra.mxu1 %v4703_v0 }
 0x14a   :  { %2256 = vmatpush1.bf16.msra.mxu0 %v4699_v63  ;;  %4315 = vmatprep.subr.bf16.mxu1 %v4707_v2  ;;  %v486_v61 = vsub.s32 2, %v5295_v52 }
 0x14b   :  { %2257 = vmatprep.subr.bf16.mxu0 %v4706_v1 }
 0x14c   :  { %v487_v63 = vrot.slane %v5298_v62, %v486_v61 }
 0x14d   :  { %4316 = vmatpush3.bf16.msra.mxu1 %v4708_v4 }
 0x14e   :  { %2258 = vmatpush1.bf16.msra.mxu0 %v4704_v3  ;;  %4317 = vmatprep.subr.bf16.mxu1 %v4712_v6 }
 0x14f   :  { %2259 = vmatprep.subr.bf16.mxu0 %v4711_v5 }
 0x151   :  { %4318 = vmatpush3.bf16.msra.mxu1 %v4713_v9  ;;  %v4779_v9 = vld [vmem:[#allocation8 + $0x14] ss:$24 sps:$4 sm:$0xff]  }
 0x152   :  { %2260 = vmatpush1.bf16.msra.mxu0 %v4709_v8  ;;  %4319 = vmatprep.subr.bf16.mxu1 %v4717_v11  ;;  %v4776_v8 = vld [vmem:[#allocation8 + $0x4] ss:$24 sps:$4 sm:$0xff]   ;;  %v4777_v11 = vld [vmem:[#allocation8 + $0x10] ss:$24 sps:$4 sm:$0xff]  }
 0x153   :  { %2261 = vmatprep.subr.bf16.mxu0 %v4716_v10  ;;  %v4774_v10 = vld [vmem:[#allocation8] ss:$24 sps:$4 sm:$0xff]  }
 0x155   :  { %4320 = vmatpush3.bf16.msra.mxu1 %v4718_v13  ;;  %v4780_v13 = vld [vmem:[#allocation8 + $0x30] ss:$24 sps:$4 sm:$0xff]  }
 0x156   :  { %2262 = vmatpush1.bf16.msra.mxu0 %v4714_v12  ;;  %4321 = vmatprep.subr.bf16.mxu1 %v4722_v15  ;;  %v4782_v12 = vld [vmem:[#allocation8 + $0x34] ss:$24 sps:$4 sm:$0xff]   ;;  %v4785_v15 = vld [vmem:[#allocation8 + $0x44] ss:$24 sps:$4 sm:$0xff]  }
 0x157   :  { %2263 = vmatprep.subr.bf16.mxu0 %v4721_v14  ;;  %v4783_v14 = vld [vmem:[#allocation8 + $0x40] ss:$24 sps:$4 sm:$0xff]  }
 0x159   :  { %4322 = vmatpush3.bf16.msra.mxu1 %v4723_v17  ;;  %v4791_v17 = vld [vmem:[#allocation8 + $0x74] ss:$24 sps:$4 sm:$0xff]  }
 0x15a   :  { %2264 = vmatpush1.bf16.msra.mxu0 %v4719_v16  ;;  %3457 = vmatprep.subr.bf16.mxu1 %v4776_v8  ;;  %v4788_v16 = vld [vmem:[#allocation8 + $0x64] ss:$24 sps:$4 sm:$0xff]  }
 0x15b   :  { %2274 = vmatprep.subr.bf16.mxu0 %v4728_v18  ;;  %v4786_v18 = vld [vmem:[#allocation8 + $0x60] ss:$24 sps:$4 sm:$0xff]   ;;  %v4857_v8 = vld [vmem:[#allocation8 + $0x284] ss:$24 sps:$4 sm:$0xff]  }
 0x15c   :  { %2548 = vmatmul.mubr.bf16.vlgmr.msra.gmra.mrb[24].mxu1 %v5285_v20 }
 0x15d   :  { %2266 = vmatmul.mubr.bf16.vlgmr.msra.gmra.mrb[0].mxu0 %v5273_v48  ;;  %v4767_v48 = vld [vmem:[#allocation5 + $0x8bc] ss:$12 sps:$4 sm:$0xff]   ;;  %3458 = vmatpush1.bf16.msra.mxu1 %v4774_v10 }
 0x15e   :  { %2275 = vmatpush1.bf16.msra.mxu0 %v4726_v19  ;;  %2306 = vmatprep.mubr.bf16.mxu0 %v5279_v57  ;;  %v4773_v57 = vld [vmem:[#allocation5 + $0x8ec] ss:$12 sps:$4 sm:$0xff]   ;;  %v4855_v10 = vld [vmem:[#allocation8 + $0x280] ss:$24 sps:$4 sm:$0xff]  }
 0x15f   :  { %2276 = vmatprep.subr.bf16.mxu0 %v4731_v21  ;;  %3459 = vmatprep.subr.bf16.mxu1 %v4782_v12  ;;  %v4789_v19 = vld [vmem:[#allocation8 + $0x70] ss:$24 sps:$4 sm:$0xff]   ;;  %v4797_v21 = vld [vmem:[#allocation8 + $0xa4] ss:$24 sps:$4 sm:$0xff]   ;;  %v4863_v12 = vld [vmem:[#allocation8 + $0x2b4] ss:$24 sps:$4 sm:$0xff]  }
 0x161   :  { %3460 = vmatpush1.bf16.msra.mxu1 %v4780_v13  ;;  %v4858_v13 = vld [vmem:[#allocation8 + $0x2a0] ss:$24 sps:$4 sm:$0xff]  }
 0x162   :  { %2277 = vmatpush1.bf16.msra.mxu0 %v4729_v22  ;;  %3461 = vmatprep.subr.bf16.mxu1 %v4788_v16  ;;  %v4792_v22 = vld [vmem:[#allocation8 + $0x90] ss:$24 sps:$4 sm:$0xff]  }
 0x163   :  { %2278 = vmatprep.subr.bf16.mxu0 %v4734_v23  ;;  %v4795_v23 = vld [vmem:[#allocation8 + $0xa0] ss:$24 sps:$4 sm:$0xff]  }
 0x165   :  { %3462 = vmatpush1.bf16.msra.mxu1 %v4786_v18 }
 0x166   :  { %2279 = vmatpush1.bf16.msra.mxu0 %v4732_v24  ;;  %v4800_v24 = vld [vmem:[#allocation8 + $0xc4] ss:$24 sps:$4 sm:$0xff]  }
 0x167   :  { %2280 = vmatprep.subr.bf16.mxu0 %v4737_v7  ;;  %v4803_v7 = vld [vmem:[#allocation8 + $0xd4] ss:$24 sps:$4 sm:$0xff]  }
 0x16a   :  { %2281 = vmatpush1.bf16.msra.mxu0 %v4735_v25  ;;  %v4798_v25 = vld [vmem:[#allocation8 + $0xc0] ss:$24 sps:$4 sm:$0xff]  }
 0x16b   :  { %2282 = vmatprep.subr.bf16.mxu0 %v4740_v26  ;;  %v4801_v26 = vld [vmem:[#allocation8 + $0xd0] ss:$24 sps:$4 sm:$0xff]  }
 0x16e   :  { %2283 = vmatpush1.bf16.msra.mxu0 %v4738_v27  ;;  %v4806_v27 = vld [vmem:[#allocation8 + $0xf4] ss:$24 sps:$4 sm:$0xff]  }
 0x16f   :  { %2284 = vmatprep.subr.bf16.mxu0 %v4743_v28  ;;  %v5290_v31 = vpop.f32.mrb[0].mxu1  ;;  %v4809_v28 = vld [vmem:[#allocation8 + $0x104] ss:$24 sps:$4 sm:$0xff]  }
 0x170   :  { %v5292_v32 = vpop.f32.mrb[1].mxu1 }
 0x171   :  { %v2107_v34 = vpop.f32.mrb[2].mxu1 }
 0x172   :  { %2285 = vmatpush1.bf16.msra.mxu0 %v4741_v29  ;;  %v2108_v36 = vpop.f32.mrb[3].mxu1  ;;  %v4804_v29 = vld [vmem:[#allocation8 + $0xf0] ss:$24 sps:$4 sm:$0xff]   ;;  %v4815_v34 = vld [vmem:[#allocation8 + $0x134] ss:$24 sps:$4 sm:$0xff]  }
 0x173   :  { %2286 = vmatprep.subr.bf16.mxu0 %v4746_v30  ;;  %v4807_v30 = vld [vmem:[#allocation8 + $0x100] ss:$24 sps:$4 sm:$0xff]   ;;  %v4813_v36 = vld [vmem:[#allocation8 + $0x130] ss:$24 sps:$4 sm:$0xff]  }
 0x176   :  { %2287 = vmatpush1.bf16.msra.mxu0 %v4744_v33  ;;  %v4812_v33 = vld [vmem:[#allocation8 + $0x124] ss:$24 sps:$4 sm:$0xff]  }
 0x177   :  { %2288 = vmatprep.subr.bf16.mxu0 %v4749_v35  ;;  %v4810_v35 = vld [vmem:[#allocation8 + $0x120] ss:$24 sps:$4 sm:$0xff]  }
 0x17a   :  { %2289 = vmatpush1.bf16.msra.mxu0 %v4747_v37  ;;  %v4818_v37 = vld [vmem:[#allocation8 + $0x154] ss:$24 sps:$4 sm:$0xff]  }
 0x17b   :  { %2290 = vmatprep.subr.bf16.mxu0 %v4752_v38  ;;  %v4821_v38 = vld [vmem:[#allocation8 + $0x164] ss:$24 sps:$4 sm:$0xff]  }
 0x17e   :  { %2291 = vmatpush1.bf16.msra.mxu0 %v4750_v39 }
 0x17f   :  { %2292 = vmatprep.subr.bf16.mxu0 %v4755_v40 }
 0x182   :  { %2293 = vmatpush1.bf16.msra.mxu0 %v4753_v41  ;;  %v4816_v41 = vld [vmem:[#allocation8 + $0x150] ss:$24 sps:$4 sm:$0xff]  }
 0x183   :  { %2294 = vmatprep.subr.bf16.mxu0 %v4758_v42  ;;  %v4819_v42 = vld [vmem:[#allocation8 + $0x160] ss:$24 sps:$4 sm:$0xff]  }
 0x186   :  { %2295 = vmatpush1.bf16.msra.mxu0 %v4756_v43 }
 0x187   :  { %2296 = vmatprep.subr.bf16.mxu0 %v4761_v44 }
 0x18a   :  { %2297 = vmatpush1.bf16.msra.mxu0 %v4759_v45  ;;  %v4824_v45 = vld [vmem:[#allocation8 + $0x184] ss:$24 sps:$4 sm:$0xff]  }
 0x18b   :  { %2298 = vmatprep.subr.bf16.mxu0 %v4764_v46  ;;  %v4827_v46 = vld [vmem:[#allocation8 + $0x194] ss:$24 sps:$4 sm:$0xff]  }
 0x18e   :  { %2299 = vmatpush1.bf16.msra.mxu0 %v4762_v47 }
 0x18f   :  { %2300 = vmatprep.subr.bf16.mxu0 %v4767_v48  ;;  %v4213_v51 = vpop.f32.mrb[4].mxu1 }
 0x190   :  { %v4214_v53 = vpop.f32.mrb[5].mxu1 }
 0x191   :  { %v4215_v55 = vadd.f32 %v4214_v53, %v4213_v51  ;;  %v4216_v56 = vpop.f32.mrb[6].mxu1  ;;  %v4830_v51 = vld [vmem:[#allocation8 + $0x1b4] ss:$24 sps:$4 sm:$0xff]   ;;  %v4833_v53 = vld [vmem:[#allocation8 + $0x1c4] ss:$24 sps:$4 sm:$0xff]  }
 0x192   :  { %2301 = vmatpush1.bf16.msra.mxu0 %v4765_v49  ;;  %v4217_v58 = vpop.f32.mrb[7].mxu1  ;;  %v4822_v49 = vld [vmem:[#allocation8 + $0x180] ss:$24 sps:$4 sm:$0xff]   ;;  %v4836_v56 = vld [vmem:[#allocation8 + $0x1e4] ss:$24 sps:$4 sm:$0xff]  }
 0x193   :  { %2302 = vmatprep.subr.bf16.mxu0 %v4770_v50  ;;  %v2350_v0 = vadd.f32 %v4215_v55, %v487_v63  ;;  %v4825_v50 = vld [vmem:[#allocation8 + $0x190] ss:$24 sps:$4 sm:$0xff]   ;;  %v4831_v55 = vld [vmem:[#allocation8 + $0x1c0] ss:$24 sps:$4 sm:$0xff]   ;;  %v4845_v63 = vld [vmem:[#allocation8 + $0x224] ss:$24 sps:$4 sm:$0xff]  }
 0x194   :  { %v4834_v58 = vld [vmem:[#allocation8 + $0x1e0] ss:$24 sps:$4 sm:$0xff]  }
 0x196   :  { %2303 = vmatpush1.bf16.msra.mxu0 %v4768_v54  ;;  %v4828_v54 = vld [vmem:[#allocation8 + $0x1b0] ss:$24 sps:$4 sm:$0xff]  }
 0x197   :  { %2304 = vmatprep.subr.bf16.mxu0 %v4773_v57  ;;  %v4839_v57 = vld [vmem:[#allocation8 + $0x1f4] ss:$24 sps:$4 sm:$0xff]  }
 0x19a   :  { %2305 = vmatpush1.bf16.msra.mxu0 %v4771_v59  ;;  %v4837_v59 = vld [vmem:[#allocation8 + $0x1f0] ss:$24 sps:$4 sm:$0xff]  }
 0x19b   :  { %3621 = vmatprep.subr.bf16.mxu0 %v4779_v9  ;;  %v4852_v9 = vld [vmem:[#allocation8 + $0x270] ss:$24 sps:$4 sm:$0xff]  }
 0x19d   :  { %2307 = vmatmul.mubr.bf16.vlgmr.msra.gmra.mrb[0].mxu0 %v5285_v20  ;;  %v4794_v20 = vld [vmem:[#allocation8 + $0x94] ss:$24 sps:$4 sm:$0xff]  }
 0x19e   :  { %3622 = vmatpush1.bf16.msra.mxu0 %v4777_v11  ;;  %3463 = vmatprep.subr.bf16.mxu1 %v4794_v20  ;;  %v4860_v11 = vld [vmem:[#allocation8 + $0x2a4] ss:$24 sps:$4 sm:$0xff]  }
 0x19f   :  { %3623 = vmatprep.subr.bf16.mxu0 %v4785_v15  ;;  %3464 = vmatpush1.bf16.msra.mxu1 %v4792_v22  ;;  %v4869_v20 = vld [vmem:[#allocation8 + $0x2e4] ss:$24 sps:$4 sm:$0xff]   ;;  %v4864_v22 = vld [vmem:[#allocation8 + $0x2d0] ss:$24 sps:$4 sm:$0xff]  }
 0x1a0   :  { %3465 = vmatprep.subr.bf16.mxu1 %v4800_v24 }
 0x1a2   :  { %3624 = vmatpush1.bf16.msra.mxu0 %v4783_v14  ;;  %v4861_v14 = vld [vmem:[#allocation8 + $0x2b0] ss:$24 sps:$4 sm:$0xff]  }
 0x1a3   :  { %3625 = vmatprep.subr.bf16.mxu0 %v4791_v17  ;;  %3466 = vmatpush1.bf16.msra.mxu1 %v4798_v25  ;;  %v4875_v25 = vld [vmem:[#allocation8 + $0x314] ss:$24 sps:$4 sm:$0xff]  }
 0x1a4   :  { %3467 = vmatprep.subr.bf16.mxu1 %v4806_v27 }
 0x1a6   :  { %3626 = vmatpush1.bf16.msra.mxu0 %v4789_v19  ;;  %v4866_v19 = vld [vmem:[#allocation8 + $0x2d4] ss:$24 sps:$4 sm:$0xff]  }
 0x1a7   :  { %3627 = vmatprep.subr.bf16.mxu0 %v4797_v21  ;;  %3468 = vmatpush1.bf16.msra.mxu1 %v4804_v29 }
 0x1a8   :  { %3469 = vmatprep.subr.bf16.mxu1 %v4812_v33 }
 0x1aa   :  { %3628 = vmatpush1.bf16.msra.mxu0 %v4795_v23  ;;  %v4867_v23 = vld [vmem:[#allocation8 + $0x2e0] ss:$24 sps:$4 sm:$0xff]  }
 0x1ab   :  { %3629 = vmatprep.subr.bf16.mxu0 %v4803_v7  ;;  %3470 = vmatpush1.bf16.msra.mxu1 %v4810_v35  ;;  %v4872_v7 = vld [vmem:[#allocation8 + $0x304] ss:$24 sps:$4 sm:$0xff]  }
 0x1ac   :  { %3471 = vmatprep.subr.bf16.mxu1 %v4818_v37 }
 0x1ae   :  { %3630 = vmatpush1.bf16.msra.mxu0 %v4801_v26 }
 0x1af   :  { %v4235_v1 = vpop.f32.mrb[8].mxu1  ;;  %3631 = vmatprep.subr.bf16.mxu0 %v4809_v28  ;;  %3472 = vmatpush1.bf16.msra.mxu1 %v4816_v41  ;;  %v482_v41 = vsub.s32 1, %v5295_v52 }
 0x1b0   :  { %v4236_v2 = vpop.f32.mrb[9].mxu1  ;;  %3473 = vmatprep.subr.bf16.mxu1 %v4824_v45 }
 0x1b1   :  { %v4237_v3 = vadd.f32 %v4236_v2, %v4235_v1  ;;  %v4238_v4 = vpop.f32.mrb[10].mxu1  ;;  %v4843_v1 = vld [vmem:[#allocation8 + $0x220] ss:$24 sps:$4 sm:$0xff]   ;;  %v4848_v2 = vld [vmem:[#allocation8 + $0x244] ss:$24 sps:$4 sm:$0xff]  }
 0x1b2   :  { %v4239_v5 = vpop.f32.mrb[11].mxu1  ;;  %3632 = vmatpush1.bf16.msra.mxu0 %v4807_v30  ;;  %v4846_v4 = vld [vmem:[#allocation8 + $0x240] ss:$24 sps:$4 sm:$0xff]  }
 0x1b3   :  { %v5303_v6 = vadd.f32 %v4237_v3, %v2350_v0  ;;  %3633 = vmatprep.subr.bf16.mxu0 %v4815_v34  ;;  %3474 = vmatpush1.bf16.msra.mxu1 %v4822_v49  ;;  %v4840_v0 = vld [vmem:[#allocation8 + $0x210] ss:$24 sps:$4 sm:$0xff]   ;;  %v4851_v3 = vld [vmem:[#allocation8 + $0x254] ss:$24 sps:$4 sm:$0xff]  }
 0x1b4   :  { %3475 = vmatprep.subr.bf16.mxu1 %v4830_v51  ;;  %v4849_v5 = vld [vmem:[#allocation8 + $0x250] ss:$24 sps:$4 sm:$0xff]  }
 0x1b6   :  { %3634 = vmatpush1.bf16.msra.mxu0 %v4813_v36 }
 0x1b7   :  { %3635 = vmatprep.subr.bf16.mxu0 %v4821_v38  ;;  %3476 = vmatpush1.bf16.msra.mxu1 %v4828_v54 }
 0x1b8   :  { %3477 = vmatprep.subr.bf16.mxu1 %v4836_v56  ;;  %v4870_v56 = vld [vmem:[#allocation8 + $0x300] ss:$24 sps:$4 sm:$0xff]  }
 0x1ba   :  { %3636 = vmatpush1.bf16.msra.mxu0 %v4819_v42 }
 0x1bb   :  { %3637 = vmatprep.subr.bf16.mxu0 %v4827_v46  ;;  %3478 = vmatpush1.bf16.msra.mxu1 %v4834_v58 }
 0x1bc   :  { %3479 = vmatprep.subr.bf16.mxu1 %v4842_v60  ;;  %v4884_v60 = vld [vmem:[#allocation8 + $0x364] ss:$24 sps:$4 sm:$0xff]  }
 0x1be   :  { %3638 = vmatpush1.bf16.msra.mxu0 %v4825_v50 }
 0x1bf   :  { %3639 = vmatprep.subr.bf16.mxu0 %v4833_v53  ;;  %3480 = vmatpush1.bf16.msra.mxu1 %v4840_v0  ;;  %v5139_v0 = vmov 0  }
 0x1c0   :  { %3481 = vmatprep.subr.bf16.mxu1 %v4848_v2  ;;  %v4885_v2 = vld [vmem:[#allocation8 + $0x370] ss:$24 sps:$4 sm:$0xff]  }
 0x1c2   :  { %3640 = vmatpush1.bf16.msra.mxu0 %v4831_v55 }
 0x1c3   :  { %3641 = vmatprep.subr.bf16.mxu0 %v4839_v57  ;;  %3482 = vmatpush1.bf16.msra.mxu1 %v4846_v4  ;;  %v4873_v57 = vld [vmem:[#allocation8 + $0x310] ss:$24 sps:$4 sm:$0xff]   ;;  %v4893_v4 = vld [vmem:[#allocation8 + $0x3a4] ss:$24 sps:$4 sm:$0xff]  }
 0x1c6   :  { %3642 = vmatpush1.bf16.msra.mxu0 %v4837_v59  ;;  %v4878_v59 = vld [vmem:[#allocation8 + $0x334] ss:$24 sps:$4 sm:$0xff]  }
 0x1c7   :  { %3643 = vmatprep.subr.bf16.mxu0 %v4845_v63  ;;  %v4887_v63 = vld [vmem:[#allocation8 + $0x374] ss:$24 sps:$4 sm:$0xff]  }
 0x1ca   :  { %3644 = vmatpush1.bf16.msra.mxu0 %v4843_v1  ;;  %v4882_v1 = vld [vmem:[#allocation8 + $0x360] ss:$24 sps:$4 sm:$0xff]  }
 0x1cb   :  { %3645 = vmatprep.subr.bf16.mxu0 %v4851_v3  ;;  %v4890_v3 = vld [vmem:[#allocation8 + $0x394] ss:$24 sps:$4 sm:$0xff]  }
 0x1ce   :  { %3646 = vmatpush1.bf16.msra.mxu0 %v4849_v5  ;;  %v4888_v5 = vld [vmem:[#allocation8 + $0x390] ss:$24 sps:$4 sm:$0xff]  }
 0x1cf   :  { %v4257_v39 = vpop.f32.mrb[12].mxu1  ;;  %3647 = vmatprep.subr.bf16.mxu0 %v4857_v8  ;;  %v4896_v8 = vld [vmem:[#allocation8 + $0x3c4] ss:$24 sps:$4 sm:$0xff]  }
 0x1d0   :  { %v4258_v40 = vpop.f32.mrb[13].mxu1 }
 0x1d1   :  { %v4259_v43 = vadd.f32 %v4258_v40, %v4257_v39  ;;  %v4260_v44 = vpop.f32.mrb[14].mxu1  ;;  %v478_v40 = vsub.s32 0, %v5295_v52 }
 0x1d2   :  { %v4261_v47 = vpop.f32.mrb[15].mxu1  ;;  %3648 = vmatpush1.bf16.msra.mxu0 %v4855_v10  ;;  %v4894_v10 = vld [vmem:[#allocation8 + $0x3c0] ss:$24 sps:$4 sm:$0xff]  }
 0x1d3   :  { %v5306_v48 = vadd.f32 %v4259_v43, %v5303_v6  ;;  %v4854_v6 = vld [vmem:[#allocation8 + $0x274] ss:$24 sps:$4 sm:$0xff]   ;;  %3649 = vmatprep.subr.bf16.mxu0 %v4863_v12  ;;  %v479_v42 = vrot.slane %v5298_v62, %v478_v40  ;;  %v483_v43 = vrot.slane %v5298_v62, %v482_v41  ;;  %v4881_v62 = vld [vmem:[#allocation8 + $0x344] ss:$24 sps:$4 sm:$0xff]  }
 0x1d4   :  { %3483 = vmatprep.subr.bf16.mxu1 %v4854_v6  ;;  %v4891_v6 = vld [vmem:[#allocation8 + $0x3a0] ss:$24 sps:$4 sm:$0xff]   ;;  %v4902_v12 = vld [vmem:[#allocation8 + $0x3f4] ss:$24 sps:$4 sm:$0xff]  }
 0x1d5   :  { %3484 = vmatpush1.bf16.msra.mxu1 %v4852_v9  ;;  %v2104_v44 = vadd.f32 %v5290_v31, %v479_v42  ;;  %v2106_v45 = vadd.f32 %v5292_v32, %v483_v43  ;;  %v4876_v31 = vld [vmem:[#allocation8 + $0x330] ss:$24 sps:$4 sm:$0xff]   ;;  %v4879_v32 = vld [vmem:[#allocation8 + $0x340] ss:$24 sps:$4 sm:$0xff]   ;;  %v4899_v9 = vld [vmem:[#allocation8 + $0x3d4] ss:$24 sps:$4 sm:$0xff]  }
 0x1d6   :  { %3485 = vmatprep.subr.bf16.mxu1 %v4860_v11  ;;  %3650 = vmatpush1.bf16.msra.mxu0 %v4861_v14  ;;  %v4897_v11 = vld [vmem:[#allocation8 + $0x3d0] ss:$24 sps:$4 sm:$0xff]   ;;  %v4941_v43 = vld [vmem:[#allocation8 + $0x15c] ss:$24 sps:$4 sm:$0xff]  }
 0x1d7   :  { %3651 = vmatprep.subr.bf16.mxu0 %v4869_v20  ;;  %v4900_v14 = vld [vmem:[#allocation8 + $0x3f0] ss:$24 sps:$4 sm:$0xff]   ;;  %v4914_v20 = vld [vmem:[#allocation8 + $0x454] ss:$24 sps:$4 sm:$0xff]  }
 0x1d8   :  { %v4936_v42 = vld [vmem:[#allocation8 + $0x128] ss:$24 sps:$4 sm:$0xff]  }
 0x1d9   :  { %3486 = vmatpush1.bf16.msra.mxu1 %v4858_v13  ;;  %v4905_v13 = vld [vmem:[#allocation8 + $0x404] ss:$24 sps:$4 sm:$0xff]  }
 0x1da   :  { %3487 = vmatprep.subr.bf16.mxu1 %v4866_v19  ;;  %3652 = vmatpush1.bf16.msra.mxu0 %v4867_v23  ;;  %v4909_v19 = vld [vmem:[#allocation8 + $0x430] ss:$24 sps:$4 sm:$0xff]   ;;  %v4915_v23 = vld [vmem:[#allocation8 + $0x460] ss:$24 sps:$4 sm:$0xff]  }
 0x1db   :  { %3662 = vmatprep.subr.bf16.mxu0 %v4875_v25  ;;  %v4918_v25 = vld [vmem:[#allocation8 + $0x8] ss:$24 sps:$4 sm:$0xff]  }
 0x1dd   :  { %3488 = vmatpush1.bf16.msra.mxu1 %v4864_v22  ;;  %v4912_v22 = vld [vmem:[#allocation8 + $0x450] ss:$24 sps:$4 sm:$0xff]  }
 0x1de   :  { %3498 = vmatprep.subr.bf16.mxu1 %v4872_v7  ;;  %v4920_v7 = vld [vmem:[#allocation8 + $0xc] ss:$24 sps:$4 sm:$0xff]  }
 0x1ef   :  { %v4279_v15 = vpop.f32.mrb[16].mxu1 }
 0x1f0   :  { %v4280_v16 = vpop.f32.mrb[17].mxu1 }
 0x1f1   :  { %v4281_v17 = vadd.f32 %v4280_v16, %v4279_v15  ;;  %v4282_v18 = vpop.f32.mrb[18].mxu1  ;;  %v4903_v15 = vld [vmem:[#allocation8 + $0x400] ss:$24 sps:$4 sm:$0xff]   ;;  %v4908_v16 = vld [vmem:[#allocation8 + $0x424] ss:$24 sps:$4 sm:$0xff]  }
 0x1f2   :  { %v4283_v21 = vpop.f32.mrb[19].mxu1  ;;  %v4906_v18 = vld [vmem:[#allocation8 + $0x420] ss:$24 sps:$4 sm:$0xff]  }
 0x1f3   :  { %v2470_v24 = vadd.f32 %v4281_v17, %v5306_v48  ;;  %v4911_v17 = vld [vmem:[#allocation8 + $0x434] ss:$24 sps:$4 sm:$0xff]   ;;  %v4917_v21 = vld [vmem:[#allocation8 + $0x464] ss:$24 sps:$4 sm:$0xff]  }
 0x20f   :  { %v4301_v26 = vpop.f32.mrb[20].mxu1 }
 0x210   :  { %v4302_v27 = vpop.f32.mrb[21].mxu1 }
 0x211   :  { %v4303_v28 = vadd.f32 %v4302_v27, %v4301_v26  ;;  %v4304_v29 = vpop.f32.mrb[22].mxu1  ;;  %v4923_v27 = vld [vmem:[#allocation8 + $0x3c] ss:$24 sps:$4 sm:$0xff]  }
 0x212   :  { %v4305_v30 = vpop.f32.mrb[23].mxu1  ;;  %v4926_v29 = vld [vmem:[#allocation8 + $0x6c] ss:$24 sps:$4 sm:$0xff]  }
 0x213   :  { %v2510_v33 = vadd.f32 %v4303_v28, %v2470_v24  ;;  %v4921_v28 = vld [vmem:[#allocation8 + $0x38] ss:$24 sps:$4 sm:$0xff]   ;;  %v4924_v30 = vld [vmem:[#allocation8 + $0x68] ss:$24 sps:$4 sm:$0xff]  }
 0x22f   :  { %v4323_v34 = vpop.f32.mrb[24].mxu1 }
 0x230   :  { %v4324_v35 = vpop.f32.mrb[25].mxu1 }
 0x231   :  { %v4325_v36 = vadd.f32 %v4324_v35, %v4323_v34  ;;  %v4326_v37 = vpop.f32.mrb[26].mxu1  ;;  %v4927_v34 = vld [vmem:[#allocation8 + $0x98] ss:$24 sps:$4 sm:$0xff]   ;;  %v4932_v35 = vld [vmem:[#allocation8 + $0xcc] ss:$24 sps:$4 sm:$0xff]  }
 0x232   :  { %v4327_v38 = vpop.f32.mrb[27].mxu1  ;;  %v4935_v37 = vld [vmem:[#allocation8 + $0xfc] ss:$24 sps:$4 sm:$0xff]  }
 0x233   :  { %v5309_v39 = vadd.f32 %v4325_v36, %v2510_v33  ;;  %v4929_v33 = vld [vmem:[#allocation8 + $0x9c] ss:$24 sps:$4 sm:$0xff]   ;;  %v4930_v36 = vld [vmem:[#allocation8 + $0xc8] ss:$24 sps:$4 sm:$0xff]   ;;  %v4933_v38 = vld [vmem:[#allocation8 + $0xf8] ss:$24 sps:$4 sm:$0xff]  }
 0x235   :  { %v2557_v24 = vmax.f32 %v5309_v39, 0.0  ;;  %v4938_v39 = vld [vmem:[#allocation8 + $0x12c] ss:$24 sps:$4 sm:$0xff]  }
 0x237   :  { %v5332_v26 = vpack.c.bf16 %v2557_v24, %v2557_v24 }
 0x270   :  { %v2308_v46 = vpop.f32.mrb[0].mxu0 }
 0x271   :  { %v4330_v47 = vadd.f32 %v2308_v46, %v2104_v44  ;;  %v2310_v48 = vpop.f32.mrb[1].mxu0  ;;  %v4939_v44 = vld [vmem:[#allocation8 + $0x158] ss:$24 sps:$4 sm:$0xff]   ;;  %v4942_v46 = vld [vmem:[#allocation8 + $0x188] ss:$24 sps:$4 sm:$0xff]  }
 0x272   :  { %v4332_v49 = vadd.f32 %v2310_v48, %v2106_v45  ;;  %v2312_v50 = vpop.f32.mrb[2].mxu0  ;;  %v4944_v45 = vld [vmem:[#allocation8 + $0x18c] ss:$24 sps:$4 sm:$0xff]   ;;  %v4945_v48 = vld [vmem:[#allocation8 + $0x1b8] ss:$24 sps:$4 sm:$0xff]  }
 0x273   :  { %v2555_v51 = vmax.f32 %v4330_v47, 0.0  ;;  %v2313_v53 = vpop.f32.mrb[3].mxu0  ;;  %v4947_v47 = vld [vmem:[#allocation8 + $0x1bc] ss:$24 sps:$4 sm:$0xff]   ;;  %v4948_v50 = vld [vmem:[#allocation8 + $0x1e8] ss:$24 sps:$4 sm:$0xff]  }
 0x274   :  { %v2556_v54 = vmax.f32 %v4332_v49, 0.0  ;;  %v4950_v49 = vld [vmem:[#allocation8 + $0x1ec] ss:$24 sps:$4 sm:$0xff]   ;;  %v4951_v53 = vld [vmem:[#allocation8 + $0x218] ss:$24 sps:$4 sm:$0xff]  }
 0x275   :  { %v5323_v58 = vpack.c.bf16 %v2555_v51, %v2555_v51  ;;  %v4953_v51 = vld [vmem:[#allocation8 + $0x21c] ss:$24 sps:$4 sm:$0xff]  }
 0x276   :  { %v5321_v55 = vpack.c.bf16 %v2556_v54, %v2556_v54  ;;  %v4956_v54 = vld [vmem:[#allocation8 + $0x24c] ss:$24 sps:$4 sm:$0xff]  }
 0x278   :  { %3489 = vmatprep.mubr.bf16.mxu1 %v5321_v55  ;;  %3653 = vmatprep.mubr.bf16.mxu0 %v5321_v55 }
 0x279   :  { %3490 = vmatmul.mubr.bf16.vlgmr.msra.gmra.mrb[28].mxu1 %v5323_v58  ;;  %3654 = vmatmul.mubr.bf16.vlgmr.msra.gmra.mrb[4].mxu0 %v5323_v58 }
 0x27a   :  { %3499 = vmatpush1.bf16.msra.mxu1 %v4870_v56  ;;  %3663 = vmatpush1.bf16.msra.mxu0 %v4873_v57  ;;  %v4959_v56 = vld [vmem:[#allocation8 + $0x27c] ss:$24 sps:$4 sm:$0xff]   ;;  %v4957_v57 = vld [vmem:[#allocation8 + $0x278] ss:$24 sps:$4 sm:$0xff]  }
 0x27b   :  { %3500 = vmatprep.subr.bf16.mxu1 %v4878_v59  ;;  %3664 = vmatprep.subr.bf16.mxu0 %v4881_v62  ;;  %v4962_v59 = vld [vmem:[#allocation8 + $0x2ac] ss:$24 sps:$4 sm:$0xff]   ;;  %v4960_v62 = vld [vmem:[#allocation8 + $0x2a8] ss:$24 sps:$4 sm:$0xff]  }
 0x27c   :  { %3530 = vmatprep.mubr.bf16.mxu1 %v5139_v0  ;;  %3694 = vmatprep.mubr.bf16.mxu0 %v5139_v0 }
 0x27e   :  { %3501 = vmatpush1.bf16.msra.mxu1 %v4876_v31  ;;  %3665 = vmatpush1.bf16.msra.mxu0 %v4879_v32  ;;  %v4965_v31 = vld [vmem:[#allocation8 + $0x2dc] ss:$24 sps:$4 sm:$0xff]   ;;  %v4963_v32 = vld [vmem:[#allocation8 + $0x2d8] ss:$24 sps:$4 sm:$0xff]  }
 0x27f   :  { %3502 = vmatprep.subr.bf16.mxu1 %v4884_v60  ;;  %3666 = vmatprep.subr.bf16.mxu0 %v4887_v63  ;;  %v4968_v60 = vld [vmem:[#allocation8 + $0x30c] ss:$24 sps:$4 sm:$0xff]   ;;  %v4966_v63 = vld [vmem:[#allocation8 + $0x308] ss:$24 sps:$4 sm:$0xff]  }
 0x282   :  { %3503 = vmatpush1.bf16.msra.mxu1 %v4882_v1  ;;  %3667 = vmatpush1.bf16.msra.mxu0 %v4885_v2  ;;  %v4971_v1 = vld [vmem:[#allocation8 + $0x33c] ss:$24 sps:$4 sm:$0xff]   ;;  %v4969_v2 = vld [vmem:[#allocation8 + $0x338] ss:$24 sps:$4 sm:$0xff]  }
 0x283   :  { %3504 = vmatprep.subr.bf16.mxu1 %v4890_v3  ;;  %3668 = vmatprep.subr.bf16.mxu0 %v4893_v4  ;;  %v4974_v3 = vld [vmem:[#allocation8 + $0x36c] ss:$24 sps:$4 sm:$0xff]   ;;  %v4972_v4 = vld [vmem:[#allocation8 + $0x368] ss:$24 sps:$4 sm:$0xff]  }
 0x286   :  { %3505 = vmatpush1.bf16.msra.mxu1 %v4888_v5  ;;  %3669 = vmatpush1.bf16.msra.mxu0 %v4891_v6  ;;  %v4977_v5 = vld [vmem:[#allocation8 + $0x39c] ss:$24 sps:$4 sm:$0xff]   ;;  %v4975_v6 = vld [vmem:[#allocation8 + $0x398] ss:$24 sps:$4 sm:$0xff]  }
 0x287   :  { %3506 = vmatprep.subr.bf16.mxu1 %v4896_v8  ;;  %3670 = vmatprep.subr.bf16.mxu0 %v4899_v9  ;;  %v4980_v8 = vld [vmem:[#allocation8 + $0x3cc] ss:$24 sps:$4 sm:$0xff]   ;;  %v4978_v9 = vld [vmem:[#allocation8 + $0x3c8] ss:$24 sps:$4 sm:$0xff]  }
 0x28a   :  { %3507 = vmatpush1.bf16.msra.mxu1 %v4894_v10  ;;  %3671 = vmatpush1.bf16.msra.mxu0 %v4897_v11  ;;  %v4983_v10 = vld [vmem:[#allocation8 + $0x3fc] ss:$24 sps:$4 sm:$0xff]   ;;  %v4986_v11 = vld [vmem:[#allocation8 + $0x42c] ss:$24 sps:$4 sm:$0xff]  }
 0x28b   :  { %3508 = vmatprep.subr.bf16.mxu1 %v4902_v12  ;;  %3672 = vmatprep.subr.bf16.mxu0 %v4905_v13  ;;  %v4989_v12 = vld [vmem:[#allocation8 + $0x45c] ss:$24 sps:$4 sm:$0xff]   ;;  %v4987_v13 = vld [vmem:[#allocation8 + $0x458] ss:$24 sps:$4 sm:$0xff]  }
 0x28e   :  { %3509 = vmatpush1.bf16.msra.mxu1 %v4900_v14  ;;  %3673 = vmatpush1.bf16.msra.mxu0 %v4903_v15  ;;  %v2725_v14 = vsub.s32 4, %v5295_v52  ;;  %v2705_v15 = vld [vmem:[#allocation10] sm:$0x3f] }
 0x28f   :  { %3510 = vmatprep.subr.bf16.mxu1 %v4908_v16  ;;  %3674 = vmatprep.subr.bf16.mxu0 %v4911_v17  ;;  %v2729_v16 = vsub.s32 5, %v5295_v52  ;;  %v2710_v17 = vrot.slane %v2705_v15, %v478_v40  ;;  %v2721_v40 = vsub.s32 3, %v5295_v52 }
 0x292   :  { %3511 = vmatpush1.bf16.msra.mxu1 %v4906_v18  ;;  %3675 = vmatpush1.bf16.msra.mxu0 %v4909_v19  ;;  %v2726_v18 = vrot.slane %v2705_v15, %v2725_v14  ;;  %v2714_v19 = vrot.slane %v2705_v15, %v482_v41  ;;  %v2718_v41 = vrot.slane %v2705_v15, %v486_v61 }
 0x293   :  { %3512 = vmatprep.subr.bf16.mxu1 %v4914_v20  ;;  %3676 = vmatprep.subr.bf16.mxu0 %v4917_v21  ;;  %v2730_v20 = vrot.slane %v2705_v15, %v2729_v16 }
 0x296   :  { %3513 = vmatpush1.bf16.msra.mxu1 %v4912_v22  ;;  %3677 = vmatpush1.bf16.msra.mxu0 %v4915_v23 }
 0x297   :  { %3539 = vmatprep.subr.bf16.mxu1 %v4920_v7 }
 0x299   :  { %3531 = vmatmul.mubr.bf16.vlgmr.msra.gmra.mrb[28].mxu1 %v5332_v26  ;;  %3695 = vmatmul.mubr.bf16.vlgmr.msra.gmra.mrb[4].mxu0 %v5332_v26 }
 0x29a   :  { %3540 = vmatpush1.bf16.msra.mxu1 %v4918_v25  ;;  %3571 = vmatprep.mubr.bf16.mxu1 %v5321_v55  ;;  %v4954_v55 = vld [vmem:[#allocation8 + $0x248] ss:$24 sps:$4 sm:$0xff]  }
 0x29b   :  { %3541 = vmatprep.subr.bf16.mxu1 %v4923_v27 }
 0x29e   :  { %3542 = vmatpush1.bf16.msra.mxu1 %v4921_v28 }
 0x29f   :  { %3543 = vmatprep.subr.bf16.mxu1 %v4926_v29 }
 0x2a2   :  { %3544 = vmatpush1.bf16.msra.mxu1 %v4924_v30 }
 0x2a3   :  { %3545 = vmatprep.subr.bf16.mxu1 %v4929_v33 }
 0x2a6   :  { %3546 = vmatpush1.bf16.msra.mxu1 %v4927_v34 }
 0x2a7   :  { %3547 = vmatprep.subr.bf16.mxu1 %v4932_v35 }
 0x2aa   :  { %3548 = vmatpush1.bf16.msra.mxu1 %v4930_v36  ;;  %v2722_v36 = vrot.slane %v2705_v15, %v2721_v40 }
 0x2ab   :  { %3549 = vmatprep.subr.bf16.mxu1 %v4935_v37 }
 0x2ae   :  { %3550 = vmatpush1.bf16.msra.mxu1 %v4933_v38 }
 0x2af   :  { %3551 = vmatprep.subr.bf16.mxu1 %v4938_v39 }
 0x2b2   :  { %3552 = vmatpush1.bf16.msra.mxu1 %v4936_v42 }
 0x2b3   :  { %3553 = vmatprep.subr.bf16.mxu1 %v4941_v43 }
 0x2b6   :  { %3554 = vmatpush1.bf16.msra.mxu1 %v4939_v44 }
 0x2b7   :  { %3555 = vmatprep.subr.bf16.mxu1 %v4944_v45 }
 0x2ba   :  { %3556 = vmatpush1.bf16.msra.mxu1 %v4942_v46 }
 0x2bb   :  { %3557 = vmatprep.subr.bf16.mxu1 %v4947_v47 }
 0x2be   :  { %3558 = vmatpush1.bf16.msra.mxu1 %v4945_v48 }
 0x2bf   :  { %3559 = vmatprep.subr.bf16.mxu1 %v4950_v49 }
 0x2c2   :  { %3560 = vmatpush1.bf16.msra.mxu1 %v4948_v50 }
 0x2c3   :  { %3561 = vmatprep.subr.bf16.mxu1 %v4953_v51 }
 0x2c6   :  { %3562 = vmatpush1.bf16.msra.mxu1 %v4951_v53 }
 0x2c7   :  { %3563 = vmatprep.subr.bf16.mxu1 %v4956_v54 }
 0x2ca   :  { %3564 = vmatpush1.bf16.msra.mxu1 %v4954_v55 }
 0x2cb   :  { %3565 = vmatprep.subr.bf16.mxu1 %v4959_v56 }
 0x2ce   :  { %3566 = vmatpush1.bf16.msra.mxu1 %v4957_v57 }
 0x2cf   :  { %3567 = vmatprep.subr.bf16.mxu1 %v4962_v59 }
 0x2d2   :  { %3568 = vmatpush1.bf16.msra.mxu1 %v4960_v62 }
 0x2d3   :  { %3569 = vmatprep.subr.bf16.mxu1 %v4965_v31 }
 0x2d6   :  { %3570 = vmatpush1.bf16.msra.mxu1 %v4963_v32 }
 0x2d7   :  { %3580 = vmatprep.subr.bf16.mxu1 %v4968_v60 }
 0x2d9   :  { %3572 = vmatmul.mubr.bf16.vlgmr.msra.gmra.mrb[32].mxu1 %v5323_v58  ;;  %v4981_v58 = vld [vmem:[#allocation8 + $0x3f8] ss:$24 sps:$4 sm:$0xff]  }
 0x2da   :  { %3581 = vmatpush1.bf16.msra.mxu1 %v4966_v63  ;;  %3612 = vmatprep.mubr.bf16.mxu1 %v5139_v0  ;;  %v4984_v0 = vld [vmem:[#allocation8 + $0x428] ss:$24 sps:$4 sm:$0xff]  }
 0x2db   :  { %3582 = vmatprep.subr.bf16.mxu1 %v4971_v1 }
 0x2de   :  { %3583 = vmatpush1.bf16.msra.mxu1 %v4969_v2 }
 0x2df   :  { %3584 = vmatprep.subr.bf16.mxu1 %v4974_v3 }
 0x2e2   :  { %3585 = vmatpush1.bf16.msra.mxu1 %v4972_v4 }
 0x2e3   :  { %3586 = vmatprep.subr.bf16.mxu1 %v4977_v5 }
 0x2e6   :  { %3587 = vmatpush1.bf16.msra.mxu1 %v4975_v6 }
 0x2e7   :  { %3588 = vmatprep.subr.bf16.mxu1 %v4980_v8 }
 0x2ea   :  { %3589 = vmatpush1.bf16.msra.mxu1 %v4978_v9 }
 0x2eb   :  { %3590 = vmatprep.subr.bf16.mxu1 %v4983_v10 }
 0x2ee   :  { %3591 = vmatpush1.bf16.msra.mxu1 %v4981_v58 }
 0x2ef   :  { %3592 = vmatprep.subr.bf16.mxu1 %v4986_v11 }
 0x2f2   :  { %3593 = vmatpush1.bf16.msra.mxu1 %v4984_v0 }
 0x2f3   :  { %3594 = vmatprep.subr.bf16.mxu1 %v4989_v12 }
 0x2f6   :  { %3595 = vmatpush1.bf16.msra.mxu1 %v4987_v13 }
 0x2f9   :  { %3613 = vmatmul.mubr.bf16.vlgmr.msra.gmra.mrb[32].mxu1 %v5332_v26 }
 0x36c   :  { %v3532_v21 = vpop.f32.mrb[28].mxu1  ;;  %v3696_v22 = vpop.f32.mrb[4].mxu0 }
 0x36d   :  { %v4333_v23 = vadd.f32 %v3532_v21, %v2710_v17  ;;  %v4337_v24 = vadd.f32 %v3696_v22, %v2726_v18  ;;  %v3534_v7 = vpop.f32.mrb[29].mxu1  ;;  %v3698_v25 = vpop.f32.mrb[5].mxu0 }
 0x36e   :  { %v4334_v26 = vadd.f32 %v3534_v7, %v2714_v19  ;;  %v4338_v27 = vadd.f32 %v3698_v25, %v2730_v20  ;;  %v3536_v28 = vpop.f32.mrb[30].mxu1  ;;  %v3700_v29 = vpop.f32.mrb[6].mxu0 }
 0x36f   :  { %v3537_v30 = vpop.f32.mrb[31].mxu1  ;;  %v3701_v33 = vpop.f32.mrb[7].mxu0 }
 0x370   :  { %v4194_v34 = vpack.c.bf16 %v4334_v26, %v4333_v23  ;;  %v4196_v35 = vpack.c.bf16 %v4338_v27, %v4337_v24 }
 0x372   :  { %3727 = vst [vmem:[#allocation11] sm:$0xff] %v4194_v34  ;;  %3729 = vst [vmem:[#allocation11 + $0x10] sm:$0xff] %v4196_v35 }
 0x3cc   :  { %v3614_v37 = vpop.f32.mrb[32].mxu1 }
 0x3cd   :  { %v4335_v38 = vadd.f32 %v3614_v37, %v2718_v41  ;;  %v3616_v39 = vpop.f32.mrb[33].mxu1 }
 0x3ce   :  { %v4336_v42 = vadd.f32 %v3616_v39, %v2722_v36  ;;  %v3618_v43 = vpop.f32.mrb[34].mxu1 }
 0x3cf   :  { %v3619_v44 = vpop.f32.mrb[35].mxu1 }
 0x3d0   :  { %v4195_v45 = vpack.c.bf16 %v4336_v42, %v4335_v38 }
 0x3d2   :  { %3728 = vst [vmem:[#allocation11 + $0x8] sm:$0xff] %v4195_v45 }
 0x3d3   :  { %5111 = shalt.err (!%p5108_p2)
}
 0x3d4   :  { %s5112_s6 = scalar_lea.hbm %s5366_s5, 384 }
 0x3d5   :  { %p5113_p3 = scmp.ne.s32.totalorder %s5366_s5, %s5112_s6  ;;  %p5116_p4 = scmp.lt.u32.totalorder %s5112_s6, %s5366_s5 }
 0x3d7   :  { %p5118_p5 = pnand %p5116_p4, %p5113_p3 }
 0x3d9   :  { %5121 = shalt.err (!%p5118_p5)
}
 0x3da   :  { %3739 = dma.vmem_to_hbm [thread:$0]  %s3737_s28, 384, %s5366_s5, [#allocation4]  }
 0x3db   :  { %5128 = dma.done.wait [#allocation4], 384  }
 0x3dc   :  { %5129 = vsyncadd [#allocation4], 4294966912 }
 0x3dd   :  { %3743 = vsyncpa [#allocation3], 1 }
 0x3de   :  { %3744 = vsyncpa [#allocation6], 1 }
 0x3df   :  { %3745 = vsyncpa [#allocation9], 1 }
 0x3e0   :  { %3746 = vsyncpa [#allocation4], 1 }

</bundles_post_ra>
